<compile_context>
chip_gen: v5e
topology: v5e:2x2
jax: 0.10.0
libtpu: 0.0.40
codegen_flags: <defaults>
</compile_context>

<pallas_src>
import functools

import jax
import jax.numpy as jnp
from jax.experimental import pallas as pl
from jax.experimental.pallas import tpu as pltpu

# ---------------- small synthetic "roberta" config ----------------
VOCAB = 128
HIDDEN = 64
N_LAYERS = 2
N_HEADS = 4
HEAD_DIM = HIDDEN // N_HEADS
INTERMEDIATE = 128
MAX_POS = 40
NUM_CLASSES = 4
LN_EPS = 1e-5
PAD_IDX = 1

BATCH = 2
SEQ = 16

_VMEM = pl.BlockSpec(memory_space=pltpu.MemorySpace.VMEM)


# ---------------- in-kernel helpers ----------------
def _ln(x, g, b, eps):
    """LayerNorm over the last (lane) dim, all f32 on the VPU path."""
    mu = jnp.mean(x, axis=-1, keepdims=True)
    xc = x - mu
    var = jnp.mean(xc * xc, axis=-1, keepdims=True)
    return xc * jax.lax.rsqrt(var + eps) * g + b


# ---------------- Pallas kernels ----------------
def _emb_ln_kernel(x_ref, g_ref, b_ref, o_ref, *, eps):
    o_ref[...] = _ln(x_ref[...].astype(jnp.float32),
                     g_ref[...], b_ref[...], eps).astype(o_ref.dtype)


def emb_layernorm(x, g, b):
    M, H = x.shape
    return pl.pallas_call(
        functools.partial(_emb_ln_kernel, eps=LN_EPS),
        out_shape=jax.ShapeDtypeStruct((M, H), jnp.float32),
        in_specs=[_VMEM, _VMEM, _VMEM],
        out_specs=_VMEM,
    )(x, g, b)


def _layer_kernel(x_ref, mask_ref,
                  wqkv_ref, bqkv_ref, wo_ref, bo_ref,
                  ln1g_ref, ln1b_ref,
                  w1_ref, b1_ref, w2_ref, b2_ref,
                  ln2g_ref, ln2b_ref,
                  o_ref, *, batch, seq, n_heads, head_dim, eps):
    """One full transformer encoder layer, fused in a single kernel.

    x_ref:    (B*S, H) f32 activations
    mask_ref: (B, S)   f32 additive attention bias (0 or -1e9)
    weights:  bf16 (MXU inputs), biases / LN params: f32, shaped (1, N)
    """
    H = n_heads * head_dim
    scale = 1.0 / (head_dim ** 0.5)

    x = x_ref[...].astype(jnp.float32)                           # (B*S, H)

    # ---- fused Q|K|V projection: one MXU pass over a 3H-wide weight ----
    qkv = jnp.dot(x.astype(jnp.bfloat16), wqkv_ref[...],
                  preferred_element_type=jnp.float32) + bqkv_ref[...]
    q_all = qkv[:, 0 * H:1 * H]
    k_all = qkv[:, 1 * H:2 * H]
    v_all = qkv[:, 2 * H:3 * H]

    # ---- multi-head attention; heads are contiguous head_dim-wide lane chunks ----
    ctx_rows = []
    for b in range(batch):
        bias = mask_ref[b:b + 1, :]                              # (1, S), hoisted per batch
        r0 = b * seq
        head_ctx = []
        for h in range(n_heads):
            c0 = h * head_dim
            qh = q_all[r0:r0 + seq, c0:c0 + head_dim]            # (S, DH)
            kh = k_all[r0:r0 + seq, c0:c0 + head_dim]
            vh = v_all[r0:r0 + seq, c0:c0 + head_dim]
            s = jnp.dot(qh, kh.T, preferred_element_type=jnp.float32) * scale + bias
            m = jnp.max(s, axis=-1, keepdims=True)
            p = jnp.exp(s - m)
            # divide -> EUP reciprocal (free VLIW slot) instead of a VALU divide
            p = p * pl.reciprocal(jnp.sum(p, axis=-1, keepdims=True), approx=True)
            head_ctx.append(jnp.dot(p, vh, preferred_element_type=jnp.float32))
        ctx_rows.append(jnp.concatenate(head_ctx, axis=-1))      # (S, H)
    ctx = jnp.concatenate(ctx_rows, axis=0)                      # (B*S, H)

    # ---- attention output projection + post-LN ----
    attn_out = jnp.dot(ctx.astype(jnp.bfloat16), wo_ref[...],
                       preferred_element_type=jnp.float32) + bo_ref[...]
    h1 = _ln(x + attn_out, ln1g_ref[...], ln1b_ref[...], eps)

    # ---- FFN + post-LN ----
    ff = jnp.dot(h1.astype(jnp.bfloat16), w1_ref[...],
                 preferred_element_type=jnp.float32) + b1_ref[...]
    # TODO(synk): HF roberta-base uses exact erf GELU; tanh-approx GELU kept here for a
    # guaranteed Mosaic lowering (numerically ~1e-3-close).
    ff = jax.nn.gelu(ff)
    ff2 = jnp.dot(ff.astype(jnp.bfloat16), w2_ref[...],
                  preferred_element_type=jnp.float32) + b2_ref[...]
    o_ref[...] = _ln(h1 + ff2, ln2g_ref[...], ln2b_ref[...], eps).astype(o_ref.dtype)


def transformer_layer(x, mask_bias, L):
    M, H = x.shape
    return pl.pallas_call(
        functools.partial(_layer_kernel, batch=BATCH, seq=SEQ,
                          n_heads=N_HEADS, head_dim=HEAD_DIM, eps=LN_EPS),
        out_shape=jax.ShapeDtypeStruct((M, H), jnp.float32),
        in_specs=[_VMEM] * 14,
        out_specs=_VMEM,
    )(x, mask_bias,
      L["wqkv"], L["bqkv"], L["wo"], L["bo"],
      L["ln1_g"], L["ln1_b"],
      L["w1"], L["b1"], L["w2"], L["b2"],
      L["ln2_g"], L["ln2_b"])


def _head_kernel(cls_ref, wp_ref, bp_ref, wc_ref, bc_ref, o_ref):
    """Fused pooler (tanh Linear on [CLS]) + classifier Linear."""
    x = cls_ref[...].astype(jnp.float32)
    pooled = jnp.tanh(jnp.dot(x.astype(jnp.bfloat16), wp_ref[...],
                              preferred_element_type=jnp.float32) + bp_ref[...])
    logits = jnp.dot(pooled.astype(jnp.bfloat16), wc_ref[...],
                     preferred_element_type=jnp.float32) + bc_ref[...]
    o_ref[...] = logits.astype(o_ref.dtype)


def pooler_classifier(cls, wp, bp, wc, bc):
    B = cls.shape[0]
    return pl.pallas_call(
        _head_kernel,
        out_shape=jax.ShapeDtypeStruct((B, NUM_CLASSES), jnp.float32),
        in_specs=[_VMEM] * 5,
        out_specs=_VMEM,
    )(cls, wp, bp, wc, bc)


# ---------------- parameter initialization (deterministic, synthetic) ----------------
def init_params(key):
    def normal(k, shape, std=0.02, dtype=jnp.bfloat16):
        return (std * jax.random.normal(k, shape, dtype=jnp.float32)).astype(dtype)

    keys = iter(jax.random.split(key, 64))
    zeros = lambda n: jnp.zeros((1, n), jnp.float32)
    ones = lambda n: jnp.ones((1, n), jnp.float32)

    p = {
        # embedding tables kept f32 (gathered by XLA, added on VPU path)
        "word_emb": normal(next(keys), (VOCAB, HIDDEN), dtype=jnp.float32),
        "pos_emb": normal(next(keys), (MAX_POS, HIDDEN), dtype=jnp.float32),
        "type_emb": normal(next(keys), (1, HIDDEN), dtype=jnp.float32),
        "emb_ln_g": ones(HIDDEN), "emb_ln_b": zeros(HIDDEN),
        "layers": [],
        # pooler: tanh(Linear(H, H)) applied to [CLS]
        "wp": normal(next(keys), (HIDDEN, HIDDEN)), "bp": zeros(HIDDEN),
        # classifier: Linear(H, num_classes)
        "wc": normal(next(keys), (HIDDEN, NUM_CLASSES)), "bc": zeros(NUM_CLASSES),
    }
    for _ in range(N_LAYERS):
        p["layers"].append({
            # fused Q|K|V weight: (H, 3H), MXU-friendly 192-wide N
            "wqkv": normal(next(keys), (HIDDEN, 3 * HIDDEN)), "bqkv": zeros(3 * HIDDEN),
            "wo": normal(next(keys), (HIDDEN, HIDDEN)), "bo": zeros(HIDDEN),
            "ln1_g": ones(HIDDEN), "ln1_b": zeros(HIDDEN),
            "w1": normal(next(keys), (HIDDEN, INTERMEDIATE)), "b1": zeros(INTERMEDIATE),
            "w2": normal(next(keys), (INTERMEDIATE, HIDDEN)), "b2": zeros(HIDDEN),
            "ln2_g": ones(HIDDEN), "ln2_b": zeros(HIDDEN),
        })
    return p


# ---------------- forward pass (NewsModel.forward equivalent, eval mode) ----------------
def news_model_forward(params, input_ids, attention_mask):
    B, S = input_ids.shape
    mask_i = attention_mask.astype(jnp.int32)
    mask_f = attention_mask.astype(jnp.float32)

    # RoBERTa-style position ids: padded tokens get padding_idx, real tokens count
    # from padding_idx + 1 (create_position_ids_from_input_ids semantics).
    pos_ids = jnp.cumsum(mask_i, axis=1) * mask_i + PAD_IDX

    # embeddings (gathers are glue in plain JAX / XLA)
    emb = (params["word_emb"][input_ids]
           + params["pos_emb"][pos_ids]
           + params["type_emb"][0][None, None, :])
    h = emb_layernorm(emb.reshape(B * S, HIDDEN),
                      params["emb_ln_g"], params["emb_ln_b"])

    mask_bias = (1.0 - mask_f) * -1e9                          # (B, S) additive bias

    for L in params["layers"]:
        h = transformer_layer(h, mask_bias, L)                 # one fused kernel per layer

    cls = h.reshape(B, S, HIDDEN)[:, 0, :]                     # [CLS] token
    # nn.Dropout(0.1) is the identity at inference time
    logits = pooler_classifier(cls, params["wp"], params["bp"],
                               params["wc"], params["bc"])
    return logits


if __name__ == "__main__":
    key = jax.random.PRNGKey(0)
    k_param, k_ids = jax.random.split(key)

    params = init_params(k_param)
    input_ids = jax.random.randint(k_ids, (BATCH, SEQ), 0, VOCAB, dtype=jnp.int32)
    attention_mask = jnp.ones((BATCH, SEQ), dtype=jnp.int32)
    attention_mask = attention_mask.at[1, SEQ - 3:].set(0)  # pad tail of second example

    logits = jax.jit(news_model_forward)(params, input_ids, attention_mask)
    jax.block_until_ready(logits)
    assert logits.shape == (BATCH, NUM_CLASSES)
    assert bool(jnp.all(jnp.isfinite(logits)))
    print("KERNEL_OK")
</pallas_src>

<mosaic_0001>
module attributes {stable_mosaic.version = 11 : i64} {
  func.func @_emb_ln_kernel(%arg0: memref<32x64xf32, #tpu.memory_space<vmem>>, %arg1: memref<1x64xf32, #tpu.memory_space<vmem>>, %arg2: memref<1x64xf32, #tpu.memory_space<vmem>>, %arg3: memref<32x64xf32, #tpu.memory_space<vmem>>) attributes {dimension_semantics = [], scalar_prefetch = 0 : i64, scratch_operands = 0 : i64, tpu.core_type = #tpu.core_type<tc>} {
    %c0 = arith.constant 0 : index
    %c0_0 = arith.constant 0 : index
    %0 = vector.load %arg0[%c0, %c0_0] : memref<32x64xf32, #tpu.memory_space<vmem>>, vector<32x64xf32>
    %c0_1 = arith.constant 0 : index
    %c0_2 = arith.constant 0 : index
    %1 = vector.load %arg1[%c0_1, %c0_2] : memref<1x64xf32, #tpu.memory_space<vmem>>, vector<1x64xf32>
    %c0_3 = arith.constant 0 : index
    %c0_4 = arith.constant 0 : index
    %2 = vector.load %arg2[%c0_3, %c0_4] : memref<1x64xf32, #tpu.memory_space<vmem>>, vector<1x64xf32>
    %cst = arith.constant dense<0.000000e+00> : vector<32xf32>
    %3 = vector.multi_reduction <add>, %0, %cst [1] : vector<32x64xf32> to vector<32xf32>
    %4 = vector.shape_cast %3 : vector<32xf32> to vector<32x1xf32>
    %cst_5 = arith.constant 6.400000e+01 : f32
    %5 = vector.broadcast %cst_5 : f32 to vector<32x1xf32>
    %6 = arith.divf %4, %5 : vector<32x1xf32>
    %7 = vector.broadcast %6 : vector<32x1xf32> to vector<32x64xf32>
    %8 = arith.subf %0, %7 : vector<32x64xf32>
    %9 = arith.mulf %8, %8 : vector<32x64xf32>
    %cst_6 = arith.constant dense<0.000000e+00> : vector<32xf32>
    %10 = vector.multi_reduction <add>, %9, %cst_6 [1] : vector<32x64xf32> to vector<32xf32>
    %11 = vector.shape_cast %10 : vector<32xf32> to vector<32x1xf32>
    %cst_7 = arith.constant 6.400000e+01 : f32
    %12 = vector.broadcast %cst_7 : f32 to vector<32x1xf32>
    %13 = arith.divf %11, %12 : vector<32x1xf32>
    %cst_8 = arith.constant 9.99999974E-6 : f32
    %14 = vector.broadcast %cst_8 : f32 to vector<32x1xf32>
    %15 = arith.addf %13, %14 : vector<32x1xf32>
    %16 = math.rsqrt %15 : vector<32x1xf32>
    %17 = vector.broadcast %16 : vector<32x1xf32> to vector<32x64xf32>
    %18 = arith.mulf %8, %17 : vector<32x64xf32>
    %19 = vector.broadcast %1 : vector<1x64xf32> to vector<32x64xf32>
    %20 = arith.mulf %18, %19 : vector<32x64xf32>
    %21 = vector.broadcast %2 : vector<1x64xf32> to vector<32x64xf32>
    %22 = arith.addf %20, %21 : vector<32x64xf32>
    %c0_9 = arith.constant 0 : index
    %c0_10 = arith.constant 0 : index
    %23 = vector.load %arg3[%c0_9, %c0_10] : memref<32x64xf32, #tpu.memory_space<vmem>>, vector<32x64xf32>
    tpu.vector_store %arg3[%c0_9, %c0_10], %22 {strides = array<i32>} : memref<32x64xf32, #tpu.memory_space<vmem>>, vector<32x64xf32>,
    return
  }
}

module attributes {stable_mosaic.version = 11 : i64} {
  func.func @_layer_kernel(%arg0: memref<32x64xf32, #tpu.memory_space<vmem>>, %arg1: memref<2x16xf32, #tpu.memory_space<vmem>>, %arg2: memref<64x192xbf16, #tpu.memory_space<vmem>>, %arg3: memref<1x192xf32, #tpu.memory_space<vmem>>, %arg4: memref<64x64xbf16, #tpu.memory_space<vmem>>, %arg5: memref<1x64xf32, #tpu.memory_space<vmem>>, %arg6: memref<1x64xf32, #tpu.memory_space<vmem>>, %arg7: memref<1x64xf32, #tpu.memory_space<vmem>>, %arg8: memref<64x128xbf16, #tpu.memory_space<vmem>>, %arg9: memref<1x128xf32, #tpu.memory_space<vmem>>, %arg10: memref<128x64xbf16, #tpu.memory_space<vmem>>, %arg11: memref<1x64xf32, #tpu.memory_space<vmem>>, %arg12: memref<1x64xf32, #tpu.memory_space<vmem>>, %arg13: memref<1x64xf32, #tpu.memory_space<vmem>>, %arg14: memref<32x64xf32, #tpu.memory_space<vmem>>) attributes {dimension_semantics = [], scalar_prefetch = 0 : i64, scratch_operands = 0 : i64, tpu.core_type = #tpu.core_type<tc>} {
    %c0 = arith.constant 0 : index
    %c0_0 = arith.constant 0 : index
    %0 = vector.load %arg0[%c0, %c0_0] : memref<32x64xf32, #tpu.memory_space<vmem>>, vector<32x64xf32>
    %1 = arith.truncf %0 : vector<32x64xf32> to vector<32x64xbf16>
    %c0_1 = arith.constant 0 : index
    %c0_2 = arith.constant 0 : index
    %2 = vector.load %arg2[%c0_1, %c0_2] : memref<64x192xbf16, #tpu.memory_space<vmem>>, vector<64x192xbf16>
    %cst = arith.constant dense<0.000000e+00> : vector<32x192xf32>
    %3 = tpu.matmul %1, %2, %cst {dimension_numbers = #tpu.dot_dimension_numbers<[1], [0], [0], [1], [0, 0, 1, 1], [], []>} : vector<32x64xbf16>, vector<64x192xbf16>, vector<32x192xf32> -> vector<32x192xf32>
    %c0_3 = arith.constant 0 : index
    %c0_4 = arith.constant 0 : index
    %4 = vector.load %arg3[%c0_3, %c0_4] : memref<1x192xf32, #tpu.memory_space<vmem>>, vector<1x192xf32>
    %5 = vector.broadcast %4 : vector<1x192xf32> to vector<32x192xf32>
    %6 = arith.addf %3, %5 : vector<32x192xf32>
    %7 = vector.extract_strided_slice %6 {offsets = [0, 0], sizes = [32, 64], strides = [1, 1]} : vector<32x192xf32> to vector<32x64xf32>
    %8 = vector.extract_strided_slice %6 {offsets = [0, 64], sizes = [32, 64], strides = [1, 1]} : vector<32x192xf32> to vector<32x64xf32>
    %9 = vector.extract_strided_slice %6 {offsets = [0, 128], sizes = [32, 64], strides = [1, 1]} : vector<32x192xf32> to vector<32x64xf32>
    %c0_5 = arith.constant 0 : index
    %c0_6 = arith.constant 0 : index
    %10 = vector.load %arg1[%c0_5, %c0_6] : memref<2x16xf32, #tpu.memory_space<vmem>>, vector<1x16xf32>
    %11 = vector.extract_strided_slice %7 {offsets = [0, 0], sizes = [16, 16], strides = [1, 1]} : vector<32x64xf32> to vector<16x16xf32>
    %12 = vector.extract_strided_slice %8 {offsets = [0, 0], sizes = [16, 16], strides = [1, 1]} : vector<32x64xf32> to vector<16x16xf32>
    %13 = vector.extract_strided_slice %9 {offsets = [0, 0], sizes = [16, 16], strides = [1, 1]} : vector<32x64xf32> to vector<16x16xf32>
    %14 = tpu.transpose %12, [1, 0] : vector<16x16xf32> -> vector<16x16xf32>
    %cst_7 = arith.constant dense<0.000000e+00> : vector<16x16xf32>
    %15 = tpu.matmul %11, %14, %cst_7 {dimension_numbers = #tpu.dot_dimension_numbers<[1], [0], [0], [1], [0, 0, 1, 1], [], []>} : vector<16x16xf32>, vector<16x16xf32>, vector<16x16xf32> -> vector<16x16xf32>
    %cst_8 = arith.constant 2.500000e-01 : f32
    %16 = vector.broadcast %cst_8 : f32 to vector<16x16xf32>
    %17 = arith.mulf %15, %16 : vector<16x16xf32>
    %18 = vector.broadcast %10 : vector<1x16xf32> to vector<16x16xf32>
    %19 = arith.addf %17, %18 : vector<16x16xf32>
    %cst_9 = arith.constant dense<0xFF800000> : vector<16xf32>
    %20 = vector.multi_reduction <maximumf>, %19, %cst_9 [1] : vector<16x16xf32> to vector<16xf32>
    %21 = vector.shape_cast %20 : vector<16xf32> to vector<16x1xf32>
    %22 = vector.broadcast %21 : vector<16x1xf32> to vector<16x16xf32>
    %23 = arith.subf %19, %22 : vector<16x16xf32>
    %24 = math.exp %23 : vector<16x16xf32>
    %cst_10 = arith.constant dense<0.000000e+00> : vector<16xf32>
    %25 = vector.multi_reduction <add>, %24, %cst_10 [1] : vector<16x16xf32> to vector<16xf32>
    %26 = vector.shape_cast %25 : vector<16xf32> to vector<16x1xf32>
    %27 = tpu.reciprocal %26 {approx = true} : vector<16x1xf32> -> vector<16x1xf32>
    %28 = vector.broadcast %27 : vector<16x1xf32> to vector<16x16xf32>
    %29 = arith.mulf %24, %28 : vector<16x16xf32>
    %cst_11 = arith.constant dense<0.000000e+00> : vector<16x16xf32>
    %30 = tpu.matmul %29, %13, %cst_11 {dimension_numbers = #tpu.dot_dimension_numbers<[1], [0], [0], [1], [0, 0, 1, 1], [], []>} : vector<16x16xf32>, vector<16x16xf32>, vector<16x16xf32> -> vector<16x16xf32>
    %31 = vector.extract_strided_slice %7 {offsets = [0, 16], sizes = [16, 16], strides = [1, 1]} : vector<32x64xf32> to vector<16x16xf32>
    %32 = vector.extract_strided_slice %8 {offsets = [0, 16], sizes = [16, 16], strides = [1, 1]} : vector<32x64xf32> to vector<16x16xf32>
    %33 = vector.extract_strided_slice %9 {offsets = [0, 16], sizes = [16, 16], strides = [1, 1]} : vector<32x64xf32> to vector<16x16xf32>
    %34 = tpu.transpose %32, [1, 0] : vector<16x16xf32> -> vector<16x16xf32>
    %cst_12 = arith.constant dense<0.000000e+00> : vector<16x16xf32>
    %35 = tpu.matmul %31, %34, %cst_12 {dimension_numbers = #tpu.dot_dimension_numbers<[1], [0], [0], [1], [0, 0, 1, 1], [], []>} : vector<16x16xf32>, vector<16x16xf32>, vector<16x16xf32> -> vector<16x16xf32>
    %cst_13 = arith.constant 2.500000e-01 : f32
    %36 = vector.broadcast %cst_13 : f32 to vector<16x16xf32>
    %37 = arith.mulf %35, %36 : vector<16x16xf32>
    %38 = vector.broadcast %10 : vector<1x16xf32> to vector<16x16xf32>
    %39 = arith.addf %37, %38 : vector<16x16xf32>
    %cst_14 = arith.constant dense<0xFF800000> : vector<16xf32>
    %40 = vector.multi_reduction <maximumf>, %39, %cst_14 [1] : vector<16x16xf32> to vector<16xf32>
    %41 = vector.shape_cast %40 : vector<16xf32> to vector<16x1xf32>
    %42 = vector.broadcast %41 : vector<16x1xf32> to vector<16x16xf32>
    %43 = arith.subf %39, %42 : vector<16x16xf32>
    %44 = math.exp %43 : vector<16x16xf32>
    %cst_15 = arith.constant dense<0.000000e+00> : vector<16xf32>
    %45 = vector.multi_reduction <add>, %44, %cst_15 [1] : vector<16x16xf32> to vector<16xf32>
    %46 = vector.shape_cast %45 : vector<16xf32> to vector<16x1xf32>
    %47 = tpu.reciprocal %46 {approx = true} : vector<16x1xf32> -> vector<16x1xf32>
    %48 = vector.broadcast %47 : vector<16x1xf32> to vector<16x16xf32>
    %49 = arith.mulf %44, %48 : vector<16x16xf32>
    %cst_16 = arith.constant dense<0.000000e+00> : vector<16x16xf32>
    %50 = tpu.matmul %49, %33, %cst_16 {dimension_numbers = #tpu.dot_dimension_numbers<[1], [0], [0], [1], [0, 0, 1, 1], [], []>} : vector<16x16xf32>, vector<16x16xf32>, vector<16x16xf32> -> vector<16x16xf32>
    %51 = vector.extract_strided_slice %7 {offsets = [0, 32], sizes = [16, 16], strides = [1, 1]} : vector<32x64xf32> to vector<16x16xf32>
    %52 = vector.extract_strided_slice %8 {offsets = [0, 32], sizes = [16, 16], strides = [1, 1]} : vector<32x64xf32> to vector<16x16xf32>
    %53 = vector.extract_strided_slice %9 {offsets = [0, 32], sizes = [16, 16], strides = [1, 1]} : vector<32x64xf32> to vector<16x16xf32>
    %54 = tpu.transpose %52, [1, 0] : vector<16x16xf32> -> vector<16x16xf32>
    %cst_17 = arith.constant dense<0.000000e+00> : vector<16x16xf32>
    %55 = tpu.matmul %51, %54, %cst_17 {dimension_numbers = #tpu.dot_dimension_numbers<[1], [0], [0], [1], [0, 0, 1, 1], [], []>} : vector<16x16xf32>, vector<16x16xf32>, vector<16x16xf32> -> vector<16x16xf32>
    %cst_18 = arith.constant 2.500000e-01 : f32
    %56 = vector.broadcast %cst_18 : f32 to vector<16x16xf32>
    %57 = arith.mulf %55, %56 : vector<16x16xf32>
    %58 = vector.broadcast %10 : vector<1x16xf32> to vector<16x16xf32>
    %59 = arith.addf %57, %58 : vector<16x16xf32>
    %cst_19 = arith.constant dense<0xFF800000> : vector<16xf32>
    %60 = vector.multi_reduction <maximumf>, %59, %cst_19 [1] : vector<16x16xf32> to vector<16xf32>
    %61 = vector.shape_cast %60 : vector<16xf32> to vector<16x1xf32>
    %62 = vector.broadcast %61 : vector<16x1xf32> to vector<16x16xf32>
    %63 = arith.subf %59, %62 : vector<16x16xf32>
    %64 = math.exp %63 : vector<16x16xf32>
    %cst_20 = arith.constant dense<0.000000e+00> : vector<16xf32>
    %65 = vector.multi_reduction <add>, %64, %cst_20 [1] : vector<16x16xf32> to vector<16xf32>
    %66 = vector.shape_cast %65 : vector<16xf32> to vector<16x1xf32>
    %67 = tpu.reciprocal %66 {approx = true} : vector<16x1xf32> -> vector<16x1xf32>
    %68 = vector.broadcast %67 : vector<16x1xf32> to vector<16x16xf32>
    %69 = arith.mulf %64, %68 : vector<16x16xf32>
    %cst_21 = arith.constant dense<0.000000e+00> : vector<16x16xf32>
    %70 = tpu.matmul %69, %53, %cst_21 {dimension_numbers = #tpu.dot_dimension_numbers<[1], [0], [0], [1], [0, 0, 1, 1], [], []>} : vector<16x16xf32>, vector<16x16xf32>, vector<16x16xf32> -> vector<16x16xf32>
    %71 = vector.extract_strided_slice %7 {offsets = [0, 48], sizes = [16, 16], strides = [1, 1]} : vector<32x64xf32> to vector<16x16xf32>
    %72 = vector.extract_strided_slice %8 {offsets = [0, 48], sizes = [16, 16], strides = [1, 1]} : vector<32x64xf32> to vector<16x16xf32>
    %73 = vector.extract_strided_slice %9 {offsets = [0, 48], sizes = [16, 16], strides = [1, 1]} : vector<32x64xf32> to vector<16x16xf32>
    %74 = tpu.transpose %72, [1, 0] : vector<16x16xf32> -> vector<16x16xf32>
    %cst_22 = arith.constant dense<0.000000e+00> : vector<16x16xf32>
    %75 = tpu.matmul %71, %74, %cst_22 {dimension_numbers = #tpu.dot_dimension_numbers<[1], [0], [0], [1], [0, 0, 1, 1], [], []>} : vector<16x16xf32>, vector<16x16xf32>, vector<16x16xf32> -> vector<16x16xf32>
    %cst_23 = arith.constant 2.500000e-01 : f32
    %76 = vector.broadcast %cst_23 : f32 to vector<16x16xf32>
    %77 = arith.mulf %75, %76 : vector<16x16xf32>
    %78 = vector.broadcast %10 : vector<1x16xf32> to vector<16x16xf32>
    %79 = arith.addf %77, %78 : vector<16x16xf32>
    %cst_24 = arith.constant dense<0xFF800000> : vector<16xf32>
    %80 = vector.multi_reduction <maximumf>, %79, %cst_24 [1] : vector<16x16xf32> to vector<16xf32>
    %81 = vector.shape_cast %80 : vector<16xf32> to vector<16x1xf32>
    %82 = vector.broadcast %81 : vector<16x1xf32> to vector<16x16xf32>
    %83 = arith.subf %79, %82 : vector<16x16xf32>
    %84 = math.exp %83 : vector<16x16xf32>
    %cst_25 = arith.constant dense<0.000000e+00> : vector<16xf32>
    %85 = vector.multi_reduction <add>, %84, %cst_25 [1] : vector<16x16xf32> to vector<16xf32>
    %86 = vector.shape_cast %85 : vector<16xf32> to vector<16x1xf32>
    %87 = tpu.reciprocal %86 {approx = true} : vector<16x1xf32> -> vector<16x1xf32>
    %88 = vector.broadcast %87 : vector<16x1xf32> to vector<16x16xf32>
    %89 = arith.mulf %84, %88 : vector<16x16xf32>
    %cst_26 = arith.constant dense<0.000000e+00> : vector<16x16xf32>
    %90 = tpu.matmul %89, %73, %cst_26 {dimension_numbers = #tpu.dot_dimension_numbers<[1], [0], [0], [1], [0, 0, 1, 1], [], []>} : vector<16x16xf32>, vector<16x16xf32>, vector<16x16xf32> -> vector<16x16xf32>
    %91 = tpu.concatenate %30, %50, %70, %90 in 1 : vector<16x16xf32>, vector<16x16xf32>, vector<16x16xf32>, vector<16x16xf32> -> vector<16x64xf32>
    %c1 = arith.constant 1 : index
    %c0_27 = arith.constant 0 : index
    %92 = vector.load %arg1[%c1, %c0_27] : memref<2x16xf32, #tpu.memory_space<vmem>>, vector<1x16xf32>
    %93 = vector.extract_strided_slice %7 {offsets = [16, 0], sizes = [16, 16], strides = [1, 1]} : vector<32x64xf32> to vector<16x16xf32>
    %94 = vector.extract_strided_slice %8 {offsets = [16, 0], sizes = [16, 16], strides = [1, 1]} : vector<32x64xf32> to vector<16x16xf32>
    %95 = vector.extract_strided_slice %9 {offsets = [16, 0], sizes = [16, 16], strides = [1, 1]} : vector<32x64xf32> to vector<16x16xf32>
    %96 = tpu.transpose %94, [1, 0] : vector<16x16xf32> -> vector<16x16xf32>
    %cst_28 = arith.constant dense<0.000000e+00> : vector<16x16xf32>
    %97 = tpu.matmul %93, %96, %cst_28 {dimension_numbers = #tpu.dot_dimension_numbers<[1], [0], [0], [1], [0, 0, 1, 1], [], []>} : vector<16x16xf32>, vector<16x16xf32>, vector<16x16xf32> -> vector<16x16xf32>
    %cst_29 = arith.constant 2.500000e-01 : f32
    %98 = vector.broadcast %cst_29 : f32 to vector<16x16xf32>
    %99 = arith.mulf %97, %98 : vector<16x16xf32>
    %100 = vector.broadcast %92 : vector<1x16xf32> to vector<16x16xf32>
    %101 = arith.addf %99, %100 : vector<16x16xf32>
    %cst_30 = arith.constant dense<0xFF800000> : vector<16xf32>
    %102 = vector.multi_reduction <maximumf>, %101, %cst_30 [1] : vector<16x16xf32> to vector<16xf32>
    %103 = vector.shape_cast %102 : vector<16xf32> to vector<16x1xf32>
    %104 = vector.broadcast %103 : vector<16x1xf32> to vector<16x16xf32>
    %105 = arith.subf %101, %104 : vector<16x16xf32>
    %106 = math.exp %105 : vector<16x16xf32>
    %cst_31 = arith.constant dense<0.000000e+00> : vector<16xf32>
    %107 = vector.multi_reduction <add>, %106, %cst_31 [1] : vector<16x16xf32> to vector<16xf32>
    %108 = vector.shape_cast %107 : vector<16xf32> to vector<16x1xf32>
    %109 = tpu.reciprocal %108 {approx = true} : vector<16x1xf32> -> vector<16x1xf32>
    %110 = vector.broadcast %109 : vector<16x1xf32> to vector<16x16xf32>
    %111 = arith.mulf %106, %110 : vector<16x16xf32>
    %cst_32 = arith.constant dense<0.000000e+00> : vector<16x16xf32>
    %112 = tpu.matmul %111, %95, %cst_32 {dimension_numbers = #tpu.dot_dimension_numbers<[1], [0], [0], [1], [0, 0, 1, 1], [], []>} : vector<16x16xf32>, vector<16x16xf32>, vector<16x16xf32> -> vector<16x16xf32>
    %113 = vector.extract_strided_slice %7 {offsets = [16, 16], sizes = [16, 16], strides = [1, 1]} : vector<32x64xf32> to vector<16x16xf32>
    %114 = vector.extract_strided_slice %8 {offsets = [16, 16], sizes = [16, 16], strides = [1, 1]} : vector<32x64xf32> to vector<16x16xf32>
    %115 = vector.extract_strided_slice %9 {offsets = [16, 16], sizes = [16, 16], strides = [1, 1]} : vector<32x64xf32> to vector<16x16xf32>
    %116 = tpu.transpose %114, [1, 0] : vector<16x16xf32> -> vector<16x16xf32>
    %cst_33 = arith.constant dense<0.000000e+00> : vector<16x16xf32>
    %117 = tpu.matmul %113, %116, %cst_33 {dimension_numbers = #tpu.dot_dimension_numbers<[1], [0], [0], [1], [0, 0, 1, 1], [], []>} : vector<16x16xf32>, vector<16x16xf32>, vector<16x16xf32> -> vector<16x16xf32>
    %cst_34 = arith.constant 2.500000e-01 : f32
    %118 = vector.broadcast %cst_34 : f32 to vector<16x16xf32>
    %119 = arith.mulf %117, %118 : vector<16x16xf32>
    %120 = vector.broadcast %92 : vector<1x16xf32> to vector<16x16xf32>
    %121 = arith.addf %119, %120 : vector<16x16xf32>
    %cst_35 = arith.constant dense<0xFF800000> : vector<16xf32>
    %122 = vector.multi_reduction <maximumf>, %121, %cst_35 [1] : vector<16x16xf32> to vector<16xf32>
    %123 = vector.shape_cast %122 : vector<16xf32> to vector<16x1xf32>
    %124 = vector.broadcast %123 : vector<16x1xf32> to vector<16x16xf32>
    %125 = arith.subf %121, %124 : vector<16x16xf32>
    %126 = math.exp %125 : vector<16x16xf32>
    %cst_36 = arith.constant dense<0.000000e+00> : vector<16xf32>
    %127 = vector.multi_reduction <add>, %126, %cst_36 [1] : vector<16x16xf32> to vector<16xf32>
    %128 = vector.shape_cast %127 : vector<16xf32> to vector<16x1xf32>
    %129 = tpu.reciprocal %128 {approx = true} : vector<16x1xf32> -> vector<16x1xf32>
    %130 = vector.broadcast %129 : vector<16x1xf32> to vector<16x16xf32>
    %131 = arith.mulf %126, %130 : vector<16x16xf32>
    %cst_37 = arith.constant dense<0.000000e+00> : vector<16x16xf32>
    %132 = tpu.matmul %131, %115, %cst_37 {dimension_numbers = #tpu.dot_dimension_numbers<[1], [0], [0], [1], [0, 0, 1, 1], [], []>} : vector<16x16xf32>, vector<16x16xf32>, vector<16x16xf32> -> vector<16x16xf32>
    %133 = vector.extract_strided_slice %7 {offsets = [16, 32], sizes = [16, 16], strides = [1, 1]} : vector<32x64xf32> to vector<16x16xf32>
    %134 = vector.extract_strided_slice %8 {offsets = [16, 32], sizes = [16, 16], strides = [1, 1]} : vector<32x64xf32> to vector<16x16xf32>
    %135 = vector.extract_strided_slice %9 {offsets = [16, 32], sizes = [16, 16], strides = [1, 1]} : vector<32x64xf32> to vector<16x16xf32>
    %136 = tpu.transpose %134, [1, 0] : vector<16x16xf32> -> vector<16x16xf32>
    %cst_38 = arith.constant dense<0.000000e+00> : vector<16x16xf32>
    %137 = tpu.matmul %133, %136, %cst_38 {dimension_numbers = #tpu.dot_dimension_numbers<[1], [0], [0], [1], [0, 0, 1, 1], [], []>} : vector<16x16xf32>, vector<16x16xf32>, vector<16x16xf32> -> vector<16x16xf32>
    %cst_39 = arith.constant 2.500000e-01 : f32
    %138 = vector.broadcast %cst_39 : f32 to vector<16x16xf32>
    %139 = arith.mulf %137, %138 : vector<16x16xf32>
    %140 = vector.broadcast %92 : vector<1x16xf32> to vector<16x16xf32>
    %141 = arith.addf %139, %140 : vector<16x16xf32>
    %cst_40 = arith.constant dense<0xFF800000> : vector<16xf32>
    %142 = vector.multi_reduction <maximumf>, %141, %cst_40 [1] : vector<16x16xf32> to vector<16xf32>
    %143 = vector.shape_cast %142 : vector<16xf32> to vector<16x1xf32>
    %144 = vector.broadcast %143 : vector<16x1xf32> to vector<16x16xf32>
    %145 = arith.subf %141, %144 : vector<16x16xf32>
    %146 = math.exp %145 : vector<16x16xf32>
    %cst_41 = arith.constant dense<0.000000e+00> : vector<16xf32>
    %147 = vector.multi_reduction <add>, %146, %cst_41 [1] : vector<16x16xf32> to vector<16xf32>
    %148 = vector.shape_cast %147 : vector<16xf32> to vector<16x1xf32>
    %149 = tpu.reciprocal %148 {approx = true} : vector<16x1xf32> -> vector<16x1xf32>
    %150 = vector.broadcast %149 : vector<16x1xf32> to vector<16x16xf32>
    %151 = arith.mulf %146, %150 : vector<16x16xf32>
    %cst_42 = arith.constant dense<0.000000e+00> : vector<16x16xf32>
    %152 = tpu.matmul %151, %135, %cst_42 {dimension_numbers = #tpu.dot_dimension_numbers<[1], [0], [0], [1], [0, 0, 1, 1], [], []>} : vector<16x16xf32>, vector<16x16xf32>, vector<16x16xf32> -> vector<16x16xf32>
    %153 = vector.extract_strided_slice %7 {offsets = [16, 48], sizes = [16, 16], strides = [1, 1]} : vector<32x64xf32> to vector<16x16xf32>
    %154 = vector.extract_strided_slice %8 {offsets = [16, 48], sizes = [16, 16], strides = [1, 1]} : vector<32x64xf32> to vector<16x16xf32>
    %155 = vector.extract_strided_slice %9 {offsets = [16, 48], sizes = [16, 16], strides = [1, 1]} : vector<32x64xf32> to vector<16x16xf32>
    %156 = tpu.transpose %154, [1, 0] : vector<16x16xf32> -> vector<16x16xf32>
    %cst_43 = arith.constant dense<0.000000e+00> : vector<16x16xf32>
    %157 = tpu.matmul %153, %156, %cst_43 {dimension_numbers = #tpu.dot_dimension_numbers<[1], [0], [0], [1], [0, 0, 1, 1], [], []>} : vector<16x16xf32>, vector<16x16xf32>, vector<16x16xf32> -> vector<16x16xf32>
    %cst_44 = arith.constant 2.500000e-01 : f32
    %158 = vector.broadcast %cst_44 : f32 to vector<16x16xf32>
    %159 = arith.mulf %157, %158 : vector<16x16xf32>
    %160 = vector.broadcast %92 : vector<1x16xf32> to vector<16x16xf32>
    %161 = arith.addf %159, %160 : vector<16x16xf32>
    %cst_45 = arith.constant dense<0xFF800000> : vector<16xf32>
    %162 = vector.multi_reduction <maximumf>, %161, %cst_45 [1] : vector<16x16xf32> to vector<16xf32>
    %163 = vector.shape_cast %162 : vector<16xf32> to vector<16x1xf32>
    %164 = vector.broadcast %163 : vector<16x1xf32> to vector<16x16xf32>
    %165 = arith.subf %161, %164 : vector<16x16xf32>
    %166 = math.exp %165 : vector<16x16xf32>
    %cst_46 = arith.constant dense<0.000000e+00> : vector<16xf32>
    %167 = vector.multi_reduction <add>, %166, %cst_46 [1] : vector<16x16xf32> to vector<16xf32>
    %168 = vector.shape_cast %167 : vector<16xf32> to vector<16x1xf32>
    %169 = tpu.reciprocal %168 {approx = true} : vector<16x1xf32> -> vector<16x1xf32>
    %170 = vector.broadcast %169 : vector<16x1xf32> to vector<16x16xf32>
    %171 = arith.mulf %166, %170 : vector<16x16xf32>
    %cst_47 = arith.constant dense<0.000000e+00> : vector<16x16xf32>
    %172 = tpu.matmul %171, %155, %cst_47 {dimension_numbers = #tpu.dot_dimension_numbers<[1], [0], [0], [1], [0, 0, 1, 1], [], []>} : vector<16x16xf32>, vector<16x16xf32>, vector<16x16xf32> -> vector<16x16xf32>
    %173 = tpu.concatenate %112, %132, %152, %172 in 1 : vector<16x16xf32>, vector<16x16xf32>, vector<16x16xf32>, vector<16x16xf32> -> vector<16x64xf32>
    %174 = tpu.concatenate %91, %173 in 0 : vector<16x64xf32>, vector<16x64xf32> -> vector<32x64xf32>
    %175 = arith.truncf %174 : vector<32x64xf32> to vector<32x64xbf16>
    %c0_48 = arith.constant 0 : index
    %c0_49 = arith.constant 0 : index
    %176 = vector.load %arg4[%c0_48, %c0_49] : memref<64x64xbf16, #tpu.memory_space<vmem>>, vector<64x64xbf16>
    %cst_50 = arith.constant dense<0.000000e+00> : vector<32x64xf32>
    %177 = tpu.matmul %175, %176, %cst_50 {dimension_numbers = #tpu.dot_dimension_numbers<[1], [0], [0], [1], [0, 0, 1, 1], [], []>} : vector<32x64xbf16>, vector<64x64xbf16>, vector<32x64xf32> -> vector<32x64xf32>
    %c0_51 = arith.constant 0 : index
    %c0_52 = arith.constant 0 : index
    %178 = vector.load %arg5[%c0_51, %c0_52] : memref<1x64xf32, #tpu.memory_space<vmem>>, vector<1x64xf32>
    %179 = vector.broadcast %178 : vector<1x64xf32> to vector<32x64xf32>
    %180 = arith.addf %177, %179 : vector<32x64xf32>
    %181 = arith.addf %0, %180 : vector<32x64xf32>
    %c0_53 = arith.constant 0 : index
    %c0_54 = arith.constant 0 : index
    %182 = vector.load %arg6[%c0_53, %c0_54] : memref<1x64xf32, #tpu.memory_space<vmem>>, vector<1x64xf32>
    %c0_55 = arith.constant 0 : index
    %c0_56 = arith.constant 0 : index
    %183 = vector.load %arg7[%c0_55, %c0_56] : memref<1x64xf32, #tpu.memory_space<vmem>>, vector<1x64xf32>
    %cst_57 = arith.constant dense<0.000000e+00> : vector<32xf32>
    %184 = vector.multi_reduction <add>, %181, %cst_57 [1] : vector<32x64xf32> to vector<32xf32>
    %185 = vector.shape_cast %184 : vector<32xf32> to vector<32x1xf32>
    %cst_58 = arith.constant 6.400000e+01 : f32
    %186 = vector.broadcast %cst_58 : f32 to vector<32x1xf32>
    %187 = arith.divf %185, %186 : vector<32x1xf32>
    %188 = vector.broadcast %187 : vector<32x1xf32> to vector<32x64xf32>
    %189 = arith.subf %181, %188 : vector<32x64xf32>
    %190 = arith.mulf %189, %189 : vector<32x64xf32>
    %cst_59 = arith.constant dense<0.000000e+00> : vector<32xf32>
    %191 = vector.multi_reduction <add>, %190, %cst_59 [1] : vector<32x64xf32> to vector<32xf32>
    %192 = vector.shape_cast %191 : vector<32xf32> to vector<32x1xf32>
    %cst_60 = arith.constant 6.400000e+01 : f32
    %193 = vector.broadcast %cst_60 : f32 to vector<32x1xf32>
    %194 = arith.divf %192, %193 : vector<32x1xf32>
    %cst_61 = arith.constant 9.99999974E-6 : f32
    %195 = vector.broadcast %cst_61 : f32 to vector<32x1xf32>
    %196 = arith.addf %194, %195 : vector<32x1xf32>
    %197 = math.rsqrt %196 : vector<32x1xf32>
    %198 = vector.broadcast %197 : vector<32x1xf32> to vector<32x64xf32>
    %199 = arith.mulf %189, %198 : vector<32x64xf32>
    %200 = vector.broadcast %182 : vector<1x64xf32> to vector<32x64xf32>
    %201 = arith.mulf %199, %200 : vector<32x64xf32>
    %202 = vector.broadcast %183 : vector<1x64xf32> to vector<32x64xf32>
    %203 = arith.addf %201, %202 : vector<32x64xf32>
    %204 = arith.truncf %203 : vector<32x64xf32> to vector<32x64xbf16>
    %c0_62 = arith.constant 0 : index
    %c0_63 = arith.constant 0 : index
    %205 = vector.load %arg8[%c0_62, %c0_63] : memref<64x128xbf16, #tpu.memory_space<vmem>>, vector<64x128xbf16>
    %cst_64 = arith.constant dense<0.000000e+00> : vector<32x128xf32>
    %206 = tpu.matmul %204, %205, %cst_64 {dimension_numbers = #tpu.dot_dimension_numbers<[1], [0], [0], [1], [0, 0, 1, 1], [], []>} : vector<32x64xbf16>, vector<64x128xbf16>, vector<32x128xf32> -> vector<32x128xf32>
    %c0_65 = arith.constant 0 : index
    %c0_66 = arith.constant 0 : index
    %207 = vector.load %arg9[%c0_65, %c0_66] : memref<1x128xf32, #tpu.memory_space<vmem>>, vector<1x128xf32>
    %208 = vector.broadcast %207 : vector<1x128xf32> to vector<32x128xf32>
    %209 = arith.addf %206, %208 : vector<32x128xf32>
    %210 = arith.mulf %209, %209 : vector<32x128xf32>
    %211 = arith.mulf %209, %210 : vector<32x128xf32>
    %cst_67 = arith.constant 4.471500e-02 : f32
    %212 = vector.broadcast %cst_67 : f32 to vector<32x128xf32>
    %213 = arith.mulf %212, %211 : vector<32x128xf32>
    %214 = arith.addf %209, %213 : vector<32x128xf32>
    %cst_68 = arith.constant 0.797884583 : f32
    %215 = vector.broadcast %cst_68 : f32 to vector<32x128xf32>
    %216 = arith.mulf %215, %214 : vector<32x128xf32>
    %217 = math.tanh %216 : vector<32x128xf32>
    %cst_69 = arith.constant 1.000000e+00 : f32
    %218 = vector.broadcast %cst_69 : f32 to vector<32x128xf32>
    %219 = arith.addf %218, %217 : vector<32x128xf32>
    %cst_70 = arith.constant 5.000000e-01 : f32
    %220 = vector.broadcast %cst_70 : f32 to vector<32x128xf32>
    %221 = arith.mulf %220, %219 : vector<32x128xf32>
    %222 = arith.mulf %209, %221 : vector<32x128xf32>
    %223 = arith.truncf %222 : vector<32x128xf32> to vector<32x128xbf16>
    %c0_71 = arith.constant 0 : index
    %c0_72 = arith.constant 0 : index
    %224 = vector.load %arg10[%c0_71, %c0_72] : memref<128x64xbf16, #tpu.memory_space<vmem>>, vector<128x64xbf16>
    %cst_73 = arith.constant dense<0.000000e+00> : vector<32x64xf32>
    %225 = tpu.matmul %223, %224, %cst_73 {dimension_numbers = #tpu.dot_dimension_numbers<[1], [0], [0], [1], [0, 0, 1, 1], [], []>} : vector<32x128xbf16>, vector<128x64xbf16>, vector<32x64xf32> -> vector<32x64xf32>
    %c0_74 = arith.constant 0 : index
    %c0_75 = arith.constant 0 : index
    %226 = vector.load %arg11[%c0_74, %c0_75] : memref<1x64xf32, #tpu.memory_space<vmem>>, vector<1x64xf32>
    %227 = vector.broadcast %226 : vector<1x64xf32> to vector<32x64xf32>
    %228 = arith.addf %225, %227 : vector<32x64xf32>
    %229 = arith.addf %203, %228 : vector<32x64xf32>
    %c0_76 = arith.constant 0 : index
    %c0_77 = arith.constant 0 : index
    %230 = vector.load %arg12[%c0_76, %c0_77] : memref<1x64xf32, #tpu.memory_space<vmem>>, vector<1x64xf32>
    %c0_78 = arith.constant 0 : index
    %c0_79 = arith.constant 0 : index
    %231 = vector.load %arg13[%c0_78, %c0_79] : memref<1x64xf32, #tpu.memory_space<vmem>>, vector<1x64xf32>
    %cst_80 = arith.constant dense<0.000000e+00> : vector<32xf32>
    %232 = vector.multi_reduction <add>, %229, %cst_80 [1] : vector<32x64xf32> to vector<32xf32>
    %233 = vector.shape_cast %232 : vector<32xf32> to vector<32x1xf32>
    %cst_81 = arith.constant 6.400000e+01 : f32
    %234 = vector.broadcast %cst_81 : f32 to vector<32x1xf32>
    %235 = arith.divf %233, %234 : vector<32x1xf32>
    %236 = vector.broadcast %235 : vector<32x1xf32> to vector<32x64xf32>
    %237 = arith.subf %229, %236 : vector<32x64xf32>
    %238 = arith.mulf %237, %237 : vector<32x64xf32>
    %cst_82 = arith.constant dense<0.000000e+00> : vector<32xf32>
    %239 = vector.multi_reduction <add>, %238, %cst_82 [1] : vector<32x64xf32> to vector<32xf32>
    %240 = vector.shape_cast %239 : vector<32xf32> to vector<32x1xf32>
    %cst_83 = arith.constant 6.400000e+01 : f32
    %241 = vector.broadcast %cst_83 : f32 to vector<32x1xf32>
    %242 = arith.divf %240, %241 : vector<32x1xf32>
    %cst_84 = arith.constant 9.99999974E-6 : f32
    %243 = vector.broadcast %cst_84 : f32 to vector<32x1xf32>
    %244 = arith.addf %242, %243 : vector<32x1xf32>
    %245 = math.rsqrt %244 : vector<32x1xf32>
    %246 = vector.broadcast %245 : vector<32x1xf32> to vector<32x64xf32>
    %247 = arith.mulf %237, %246 : vector<32x64xf32>
    %248 = vector.broadcast %230 : vector<1x64xf32> to vector<32x64xf32>
    %249 = arith.mulf %247, %248 : vector<32x64xf32>
    %250 = vector.broadcast %231 : vector<1x64xf32> to vector<32x64xf32>
    %251 = arith.addf %249, %250 : vector<32x64xf32>
    %c0_85 = arith.constant 0 : index
    %c0_86 = arith.constant 0 : index
    %252 = vector.load %arg14[%c0_85, %c0_86] : memref<32x64xf32, #tpu.memory_space<vmem>>, vector<32x64xf32>
    tpu.vector_store %arg14[%c0_85, %c0_86], %251 {strides = array<i32>} : memref<32x64xf32, #tpu.memory_space<vmem>>, vector<32x64xf32>,
    return
  }
}

module attributes {stable_mosaic.version = 11 : i64} {
  func.func @_head_kernel(%arg0: memref<2x64xf32, #tpu.memory_space<vmem>>, %arg1: memref<64x64xbf16, #tpu.memory_space<vmem>>, %arg2: memref<1x64xf32, #tpu.memory_space<vmem>>, %arg3: memref<64x4xbf16, #tpu.memory_space<vmem>>, %arg4: memref<1x4xf32, #tpu.memory_space<vmem>>, %arg5: memref<2x4xf32, #tpu.memory_space<vmem>>) attributes {dimension_semantics = [], scalar_prefetch = 0 : i64, scratch_operands = 0 : i64, tpu.core_type = #tpu.core_type<tc>} {
    %c0 = arith.constant 0 : index
    %c0_0 = arith.constant 0 : index
    %0 = vector.load %arg0[%c0, %c0_0] : memref<2x64xf32, #tpu.memory_space<vmem>>, vector<2x64xf32>
    %1 = arith.truncf %0 : vector<2x64xf32> to vector<2x64xbf16>
    %c0_1 = arith.constant 0 : index
    %c0_2 = arith.constant 0 : index
    %2 = vector.load %arg1[%c0_1, %c0_2] : memref<64x64xbf16, #tpu.memory_space<vmem>>, vector<64x64xbf16>
    %cst = arith.constant dense<0.000000e+00> : vector<2x64xf32>
    %3 = tpu.matmul %1, %2, %cst {dimension_numbers = #tpu.dot_dimension_numbers<[1], [0], [0], [1], [0, 0, 1, 1], [], []>} : vector<2x64xbf16>, vector<64x64xbf16>, vector<2x64xf32> -> vector<2x64xf32>
    %c0_3 = arith.constant 0 : index
    %c0_4 = arith.constant 0 : index
    %4 = vector.load %arg2[%c0_3, %c0_4] : memref<1x64xf32, #tpu.memory_space<vmem>>, vector<1x64xf32>
    %5 = vector.broadcast %4 : vector<1x64xf32> to vector<2x64xf32>
    %6 = arith.addf %3, %5 : vector<2x64xf32>
    %7 = math.tanh %6 : vector<2x64xf32>
    %8 = arith.truncf %7 : vector<2x64xf32> to vector<2x64xbf16>
    %c0_5 = arith.constant 0 : index
    %c0_6 = arith.constant 0 : index
    %9 = vector.load %arg3[%c0_5, %c0_6] : memref<64x4xbf16, #tpu.memory_space<vmem>>, vector<64x4xbf16>
    %cst_7 = arith.constant dense<0.000000e+00> : vector<2x4xf32>
    %10 = tpu.matmul %8, %9, %cst_7 {dimension_numbers = #tpu.dot_dimension_numbers<[1], [0], [0], [1], [0, 0, 1, 1], [], []>} : vector<2x64xbf16>, vector<64x4xbf16>, vector<2x4xf32> -> vector<2x4xf32>
    %c0_8 = arith.constant 0 : index
    %c0_9 = arith.constant 0 : index
    %11 = vector.load %arg4[%c0_8, %c0_9] : memref<1x4xf32, #tpu.memory_space<vmem>>, vector<1x4xf32>
    %12 = vector.broadcast %11 : vector<1x4xf32> to vector<2x4xf32>
    %13 = arith.addf %10, %12 : vector<2x4xf32>
    %c0_10 = arith.constant 0 : index
    %c0_11 = arith.constant 0 : index
    %14 = vector.load %arg5[%c0_10, %c0_11] : memref<2x4xf32, #tpu.memory_space<vmem>>, vector<2x4xf32>
    tpu.vector_store %arg5[%c0_10, %c0_11], %13 {strides = array<i32>} : memref<2x4xf32, #tpu.memory_space<vmem>>, vector<2x4xf32>,
    return
  }
}

</mosaic_0001>

<bundles_post_ra>
// kernel: news_model_forward.4
= control target key start
LH: loop header
LB: loop body
LE: loop exit
PB: predicated region body
PF: predicated region fallthrough
CT: control target
= control target key end

     0   :  { %vm20_vm0 = vcmask 523264   ;;  %v151_v8 = vmov 64.0   ;;  %s229_s0 = inlined_call_operand.vmem [shape: f32[32,64], index: 0, kind: input, shape index: {}]   ;;  %s230_s1 = inlined_call_operand.vmem [shape: f32[1,64], index: 1, kind: input, shape index: {}]   ;;  %s231_s2 = inlined_call_operand.vmem [shape: f32[1,64], index: 2, kind: input, shape index: {}]   ;;  %s232_s3 = inlined_call_operand.vmem [shape: f32[32,64], index: 3, kind: output, shape index: {}]  }
   0x1   :  { %v16_v0 = vld [vmem:[%s229_s0 + $0x10] sm:$0xff]  ;;  %v14_v1 = vld [vmem:[%s229_s0] sm:$0xff]  ;;  %v17_v4 = vld [vmem:[%s229_s0 + $0x18] sm:$0xff]  ;;  %141 = vrcp.f32 %v151_v8 }
   0x2   :  { %v27_v2 = vsel %vm20_vm0, %v16_v0, 0.0  ;;  %v21_v3 = vsel %vm20_vm0, %v14_v1, 0.0  ;;  %v15_v5 = vld [vmem:[%s229_s0 + $0x8] sm:$0xff]  ;;  %v30_v6 = vsel %vm20_vm0, %v17_v4, 0.0  ;;  %v139_v61 = vld [vmem:[%s230_s1] ss:$0 sm:$0xff] }
   0x3   :  { %28 = vadd.xlane.f32.xlu1 %v27_v2  ;;  %22 = vadd.xlane.f32.xlu0 %v21_v3  ;;  %v24_v7 = vsel %vm20_vm0, %v15_v5, 0.0  ;;  %v140_v2 = vld [vmem:[%s231_s2] ss:$0 sm:$0xff] }
   0x7   :  { %v142_v9 = vpop.eup %141 }
   0x8   :  { %v34_v10 = vmul.f32 64.0, %v142_v9  ;;  %vm38_vm1 = vweird.f32 %v142_v9 }
   0xa   :  { %v35_v11 = vsub.f32 1.0, %v34_v10 }
   0xb   :  { %31 = vadd.xlane.f32.xlu1 %v30_v6  ;;  %25 = vadd.xlane.f32.xlu0 %v24_v7 }
   0xc   :  { %v36_v12 = vmul.f32 %v142_v9, %v35_v11 }
   0xe   :  { %v37_v13 = vadd.f32 %v142_v9, %v36_v12 }
  0x10   :  { %v39_v14 = vsel %vm38_vm1, %v142_v9, %v37_v13 }
  0x76   :  { %v29_v15 = vpop.xlane.xlu1 %28  ;;  %v23_v16 = vpop.xlane.xlu0 %22 }
  0x77   :  { %v42_v17 = vmul.f32 %v39_v14, %v29_v15  ;;  %v40_v18 = vmul.f32 %v39_v14, %v23_v16 }
  0x79   :  { %v188_v19 = vsub.f32 %v16_v0, %v42_v17  ;;  %v44_v20 = vsub.f32 %v14_v1, %v40_v18 }
  0x7b   :  { %v50_v21 = vmul.f32 %v188_v19, %v188_v19  ;;  %v48_v22 = vmul.f32 %v44_v20, %v44_v20 }
  0x7d   :  { %v58_v23 = vsel %vm20_vm0, %v50_v21, 0.0  ;;  %v52_v24 = vsel %vm20_vm0, %v48_v22, 0.0 }
  0x7e   :  { %v32_v25 = vpop.xlane.xlu1 %31  ;;  %59 = vadd.xlane.f32.xlu0 %v58_v23  ;;  %53 = vadd.xlane.f32.xlu2 %v52_v24  ;;  %v26_v26 = vpop.xlane.xlu0 %25 }
  0x7f   :  { %v43_v27 = vmul.f32 %v39_v14, %v32_v25  ;;  %v41_v28 = vmul.f32 %v39_v14, %v26_v26 }
  0x81   :  { %v194_v29 = vsub.f32 %v17_v4, %v43_v27  ;;  %v196_v30 = vsub.f32 %v15_v5, %v41_v28 }
  0x83   :  { %v51_v31 = vmul.f32 %v194_v29, %v194_v29  ;;  %v49_v32 = vmul.f32 %v196_v30, %v196_v30 }
  0x85   :  { %v61_v33 = vsel %vm20_vm0, %v51_v31, 0.0  ;;  %v55_v34 = vsel %vm20_vm0, %v49_v32, 0.0 }
  0x86   :  { %62 = vadd.xlane.f32.xlu1 %v61_v33  ;;  %56 = vadd.xlane.f32.xlu2 %v55_v34 }
  0xf1   :  { %v54_v35 = vpop.xlane.xlu2 %53  ;;  %v60_v36 = vpop.xlane.xlu0 %59 }
  0xf2   :  { %v64_v37 = vmul.f32 %v54_v35, %v39_v14  ;;  %v66_v38 = vmul.f32 %v60_v36, %v39_v14 }
  0xf4   :  { %v68_v39 = vadd.f32 1e-05, %v64_v37  ;;  %v70_v40 = vadd.f32 1e-05, %v66_v38 }
  0xf6   :  { %143 = vrsqrt.f32 %v68_v39  ;;  %vm78_vm4 = vweird.f32 %v68_v39  ;;  %vm98_vm6 = vweird.f32 %v70_v40 }
  0xf7   :  { %145 = vrsqrt.f32 %v70_v40 }
  0xf9   :  { %v63_v41 = vpop.xlane.xlu1 %62  ;;  %v57_v42 = vpop.xlane.xlu2 %56 }
  0xfa   :  { %v67_v43 = vmul.f32 %v63_v41, %v39_v14  ;;  %v65_v44 = vmul.f32 %v57_v42, %v39_v14 }
  0xfc   :  { %v144_v45 = vpop.eup %143  ;;  %v71_v46 = vadd.f32 1e-05, %v67_v43  ;;  %v69_v47 = vadd.f32 1e-05, %v65_v44 }
  0xfd   :  { %v146_v48 = vpop.eup %145  ;;  %v73_v49 = vmul.f32 %v144_v45, %v68_v39  ;;  %vm79_vm2 = vweird.f32 %v144_v45 }
  0xfe   :  { %v93_v50 = vmul.f32 %v146_v48, %v70_v40  ;;  %147 = vrsqrt.f32 %v71_v46  ;;  %vm99_vm3 = vweird.f32 %v146_v48  ;;  %vm80_vm5 = vmor %vm78_vm4, %vm79_vm2  ;;  %vm108_vm10 = vweird.f32 %v71_v46 }
  0xff   :  { %v74_v51 = vmul.f32 %v144_v45, %v73_v49  ;;  %149 = vrsqrt.f32 %v69_v47  ;;  %vm100_vm7 = vmor %vm98_vm6, %vm99_vm3  ;;  %vm88_vm12 = vweird.f32 %v69_v47 }
 0x100   :  { %v94_v52 = vmul.f32 %v146_v48, %v93_v50 }
 0x101   :  { %v75_v53 = vmul.f32 0.5, %v74_v51 }
 0x102   :  { %v95_v54 = vmul.f32 0.5, %v94_v52 }
 0x103   :  { %v76_v55 = vsub.f32 1.5, %v75_v53 }
 0x104   :  { %v148_v56 = vpop.eup %147  ;;  %v96_v57 = vsub.f32 1.5, %v95_v54 }
 0x105   :  { %v150_v58 = vpop.eup %149  ;;  %v77_v59 = vmul.f32 %v144_v45, %v76_v55  ;;  %v103_v60 = vmul.f32 %v148_v56, %v71_v46  ;;  %vm109_vm8 = vweird.f32 %v148_v56 }
 0x106   :  { %v97_v62 = vmul.f32 %v146_v48, %v96_v57  ;;  %v83_v63 = vmul.f32 %v150_v58, %v69_v47  ;;  %vm89_vm9 = vweird.f32 %v150_v58  ;;  %vm110_vm11 = vmor %vm108_vm10, %vm109_vm8 }
 0x107   :  { %v81_v0 = vsel %vm80_vm5, %v144_v45, %v77_v59  ;;  %v104_v1 = vmul.f32 %v148_v56, %v103_v60  ;;  %vm90_vm13 = vmor %vm88_vm12, %vm89_vm9 }
 0x108   :  { %v112_v3 = vmul.f32 %v81_v0, %v44_v20  ;;  %v101_v4 = vsel %vm100_vm7, %v146_v48, %v97_v62  ;;  %v84_v5 = vmul.f32 %v150_v58, %v83_v63 }
 0x109   :  { %v114_v6 = vmul.f32 %v101_v4, %v188_v19  ;;  %v105_v7 = vmul.f32 0.5, %v104_v1 }
 0x10a   :  { %v119_v8 = vmul.f32 %v139_v61, %v112_v3  ;;  %v85_v9 = vmul.f32 0.5, %v84_v5 }
 0x10b   :  { %v121_v10 = vmul.f32 %v139_v61, %v114_v6  ;;  %v106_v11 = vsub.f32 1.5, %v105_v7 }
 0x10c   :  { %v126_v12 = vadd.f32 %v140_v2, %v119_v8  ;;  %v86_v13 = vsub.f32 1.5, %v85_v9 }
 0x10d   :  { %v128_v14 = vadd.f32 %v140_v2, %v121_v10  ;;  %v107_v15 = vmul.f32 %v148_v56, %v106_v11 }
 0x10e   :  { %130 = vst.msk [vmem:[%s232_s3] sm:$0xff] %vm20_vm0, %v126_v12  ;;  %v87_v16 = vmul.f32 %v150_v58, %v86_v13 }
 0x10f   :  { %132 = vst.msk [vmem:[%s232_s3 + $0x10] sm:$0xff] %vm20_vm0, %v128_v14  ;;  %v111_v17 = vsel %vm110_vm11, %v148_v56, %v107_v15 }
 0x110   :  { %v115_v18 = vmul.f32 %v111_v17, %v194_v29  ;;  %v91_v19 = vsel %vm90_vm13, %v150_v58, %v87_v16 }
 0x111   :  { %v113_v20 = vmul.f32 %v91_v19, %v196_v30 }
 0x112   :  { %v122_v21 = vmul.f32 %v139_v61, %v115_v18 }
 0x113   :  { %v120_v22 = vmul.f32 %v139_v61, %v113_v20 }
 0x114   :  { %v129_v23 = vadd.f32 %v140_v2, %v122_v21 }
 0x115   :  { %v127_v24 = vadd.f32 %v140_v2, %v120_v22 }
 0x116   :  { %133 = vst.msk [vmem:[%s232_s3 + $0x18] sm:$0xff] %vm20_vm0, %v129_v23 }
 0x117   :  { %131 = vst.msk [vmem:[%s232_s3 + $0x8] sm:$0xff] %vm20_vm0, %v127_v24 }

// kernel: news_model_forward.7
= control target key start
LH: loop header
LB: loop body
LE: loop exit
PB: predicated region body
PF: predicated region fallthrough
CT: control target
= control target key end

     0   :  { %s289_s0 = inlined_call_operand.vmem [shape: f32[2,64], index: 0, kind: input, shape index: {}]   ;;  %s290_s1 = inlined_call_operand.vmem [shape: bf16[64,64], index: 1, kind: input, shape index: {}]   ;;  %s291_s2 = inlined_call_operand.vmem [shape: f32[1,64], index: 2, kind: input, shape index: {}]   ;;  %s292_s3 = inlined_call_operand.vmem [shape: bf16[64,4], index: 3, kind: input, shape index: {}]   ;;  %s293_s4 = inlined_call_operand.vmem [shape: f32[1,4], index: 4, kind: input, shape index: {}]   ;;  %s294_s5 = inlined_call_operand.hbm [shape: f32[2,4], index: 5, kind: output, shape index: {}]  }
   0x1   :  { %v186_v0 = vld [vmem:[%s290_s1 + $0x18] sm:$0xff]  ;;  %v185_v2 = vld [vmem:[%s290_s1 + $0x10] sm:$0xff] }
   0x2   :  { %v190_v1 = vld [vmem:[%s292_s3 + $0x18] sm:$0xff]  ;;  %68 = vmatpush.bf16.msra.mxu0 %v186_v0 }
   0x3   :  { %122 = vmatpush.bf16.msra.mxu1 %v190_v1 }
   0x4   :  { %10 = vsyncpa [#allocation3], 0  ;;  %v184_v3 = vld [vmem:[%s290_s1 + $0x8] sm:$0xff]  ;;  %v183_v4 = vld [vmem:[%s290_s1] sm:$0xff]  ;;  %vm60_vm0 = vcmask 523264   ;;  %s222_s13 = smov [#allocation2]  }
   0x5   :  { %v22_v5 = vld [vmem:[%s289_s0] sm:$0x3]  ;;  %v189_v7 = vld [vmem:[%s292_s3 + $0x10] sm:$0xff]  ;;  %v188_v8 = vld [vmem:[%s292_s3 + $0x8] sm:$0xff]  ;;  %s138_s14 = sshll.u32 %s222_s13, 4  ;;  %s140_s16 = sshll.u32 %s294_s5, 4  ;;  %s139_s14 = int_to_ptr.vmem [resolvable:$true] %s138_s14  ;;  %s141_s16 = int_to_ptr.hbm [resolvable:$true] %s140_s16 }
   0x6   :  { %69 = vmatpush.bf16.msra.mxu0 %v185_v2  ;;  %v23_v6 = vpack.c.bf16 %v22_v5, %v22_v5  ;;  %v187_v9 = vld [vmem:[%s292_s3] sm:$0xff]  ;;  %vm131_vm1 = vcmask 25600  }
   0x7   :  { %123 = vmatpush.bf16.msra.mxu1 %v189_v7  ;;  %v192_v10 = vld [vmem:[%s291_s2] ss:$0 sm:$0xff] }
   0x8   :  { %v193_v16 = vld [vmem:[%s293_s4] ss:$0 sm:$0xff] }
   0xa   :  { %70 = vmatpush.bf16.msra.mxu0 %v184_v3 }
   0xb   :  { %124 = vmatpush.bf16.msra.mxu1 %v188_v8 }
   0xe   :  { %71 = vmatpush.bf16.msra.mxu0 %v183_v4 }
   0xf   :  { %125 = vmatpush.bf16.msra.mxu1 %v187_v9 }
  0x11   :  { %165 = vmatmul.msk.bf16.vlgmr.msra.gmra.mxu0 %vm60_vm0, %v23_v6 }
  0x8e   :  { %v73_v11 = vpop.f32.mrf.mxu0 }
  0x8f   :  { %v74_v12 = vadd.f32 %v192_v10, %v73_v11 }
  0x91   :  { %194 = vtanh.f32 %v74_v12 }
  0x96   :  { %v75_v13 = vpop.f32.mrf.mxu0 }
  0x97   :  { %v195_v14 = vpop.eup %194 }
  0x98   :  { %v78_v15 = vpack.c.bf16 %v195_v14, %v195_v14 }
  0x9a   :  { %182 = vmatmul.msk.bf16.vlgmr.msra.gmra.mxu1 %vm60_vm0, %v78_v15 }
 0x117   :  { %v127_v17 = vpop.f32.mrf.mxu1 }
 0x118   :  { %v128_v18 = vadd.f32 %v193_v16, %v127_v17 }
 0x11a   :  { %132 = vst.msk [vmem:[#allocation2] sm:$0x3] %vm131_vm1, %v128_v18 }
 0x11b   :  { %143 = dma.vmem_to_hbm [thread:$0]  %s139_s14, 32, %s141_s16, [#allocation3]  }
 0x11f   :  { %v129_v19 = vpop.f32.mrf.mxu1 }
 0x120   :  { %220 = dma.done.wait [#allocation3], 32  }
 0x121   :  { %221 = vsyncadd [#allocation3], 4294967264 }
 0x122   :  { %148 = vsyncpa [#allocation3], 1 }

// kernel: news_model_forward.5
= control target key start
LH: loop header
LB: loop body
LE: loop exit
PB: predicated region body
PF: predicated region fallthrough
CT: control target
= control target key end

     0   :  { %vm108_vm0 = vcmask 523264   ;;  %s1837_s22 = smov 80   ;;  %s1838_s23 = smov 16   ;;  %vm160_vm1 = vcmask 130048   ;;  %vm576_vm2 = vcmask 261120   ;;  %vm579_vm3 = vcmask 392192   ;;  %s2442_s2 = inlined_call_operand.vmem [shape: bf16[64,192], index: 2, kind: input, shape index: {}]   ;;  %s2443_s0 = inlined_call_operand.vmem [shape: f32[32,64], index: 0, kind: input, shape index: {}]   ;;  %s2444_s3 = inlined_call_operand.vmem [shape: f32[1,192], index: 3, kind: input, shape index: {}]   ;;  %s2445_s1 = inlined_call_operand.vmem [shape: f32[2,16], index: 1, kind: input, shape index: {}]   ;;  %s2446_s4 = inlined_call_operand.vmem [shape: bf16[64,64], index: 4, kind: input, shape index: {}]   ;;  %s2447_s5 = inlined_call_operand.vmem [shape: f32[1,64], index: 5, kind: input, shape index: {}]   ;;  %s2448_s6 = inlined_call_operand.vmem [shape: f32[1,64], index: 6, kind: input, shape index: {}]   ;;  %s2449_s7 = inlined_call_operand.vmem [shape: f32[1,64], index: 7, kind: input, shape index: {}]   ;;  %s2450_s8 = inlined_call_operand.vmem [shape: bf16[64,128], index: 8, kind: input, shape index: {}]   ;;  %s2451_s9 = inlined_call_operand.vmem [shape: f32[1,128], index: 9, kind: input, shape index: {}]   ;;  %s2452_s10 = inlined_call_operand.vmem [shape: bf16[128,64], index: 10, kind: input, shape index: {}]   ;;  %s2453_s11 = inlined_call_operand.vmem [shape: f32[1,64], index: 11, kind: input, shape index: {}]   ;;  %s2454_s12 = inlined_call_operand.vmem [shape: f32[1,64], index: 12, kind: input, shape index: {}]   ;;  %s2455_s13 = inlined_call_operand.vmem [shape: f32[1,64], index: 13, kind: input, shape index: {}]   ;;  %s2456_s14 = inlined_call_operand.vmem [shape: f32[32,64], index: 14, kind: output, shape index: {}]  }
   0x1   :  { %v1516_v0 = vld [vmem:[%s2442_s2 + $0x30] sm:$0xf]  ;;  %v1649_v1 = vld [vmem:[%s2442_s2 + $0x34] sm:$0xf0]  ;;  %v1508_v2 = vld [vmem:[%s2442_s2 + $0x20] sm:$0xf] }
   0x2   :  { %v1517_v3 = vor.u32 %v1649_v1, %v1516_v0  ;;  %v1647_v4 = vld [vmem:[%s2442_s2 + $0x24] sm:$0xf0]  ;;  %v1500_v6 = vld [vmem:[%s2442_s2 + $0x10] sm:$0xf]  ;;  %v1645_v7 = vld [vmem:[%s2442_s2 + $0x14] sm:$0xf0] }
   0x3   :  { %v1509_v5 = vor.u32 %v1647_v4, %v1508_v2  ;;  %v1501_v8 = vor.u32 %v1645_v7, %v1500_v6  ;;  %v1492_v9 = vld [vmem:[%s2442_s2] sm:$0xf]  ;;  %v1643_v10 = vld [vmem:[%s2442_s2 + $0x4] sm:$0xf0]  ;;  %v1648_v11 = vld [vmem:[%s2442_s2 + $0x34] sm:$0xf] }
   0x4   :  { %119 = vmatpush.bf16.msra.mxu1 %v1517_v3  ;;  %v1518_v12 = vld [vmem:[%s2442_s2 + $0x38] sm:$0xf0]  ;;  %v1493_v13 = vor.u32 %v1643_v10, %v1492_v9  ;;  %v48_v14 = vld [vmem:[%s2443_s0] sm:$0xff]  ;;  %v49_v15 = vld [vmem:[%s2443_s0 + $0x8] sm:$0xff]  ;;  %s1839_s24 = smov 64   ;;  %s1841_s25 = smov 112  }
   0x5   :  { %v1521_v16 = vor.u32 %v1648_v11, %v1518_v12  ;;  %v1646_v17 = vld [vmem:[%s2442_s2 + $0x24] sm:$0xf]  ;;  %v1510_v18 = vld [vmem:[%s2442_s2 + $0x28] sm:$0xf0]  ;;  %v52_v19 = vpack.c.bf16 %v49_v15, %v48_v14  ;;  %v1644_v21 = vld [vmem:[%s2442_s2 + $0x14] sm:$0xf] }
   0x6   :  { %v1513_v20 = vor.u32 %v1646_v17, %v1510_v18  ;;  %v1502_v22 = vld [vmem:[%s2442_s2 + $0x18] sm:$0xf0]  ;;  %v1642_v24 = vld [vmem:[%s2442_s2 + $0x4] sm:$0xf]  ;;  %v1494_v25 = vld [vmem:[%s2442_s2 + $0x8] sm:$0xf0] }
   0x7   :  { %v1505_v23 = vor.u32 %v1644_v21, %v1502_v22  ;;  %v1497_v26 = vor.u32 %v1642_v24, %v1494_v25  ;;  %v50_v27 = vld [vmem:[%s2443_s0 + $0x10] sm:$0xff]  ;;  %v51_v28 = vld [vmem:[%s2443_s0 + $0x18] sm:$0xff]  ;;  %v62_v30 = vld [vmem:[%s2444_s3] sm:$0x3]  ;;  %s1840_s3 = smov 48   ;;  %s1842_s28 = smov 32  }
   0x8   :  { %120 = vmatpush.bf16.msra.mxu1 %v1509_v5  ;;  %v53_v29 = vpack.c.bf16 %v51_v28, %v50_v27  ;;  %v64_v31 = vperm.slane %v62_v30, 0  ;;  %v2013_v41 = vperm.slane %v62_v30, 1  ;;  %v2032_v53 = vld [vmem:[%s2445_s1] ss:$0 sm:$0xff]  ;;  %s1843_s29 = smov 96  }
   0xc   :  { %121 = vmatpush.bf16.msra.mxu1 %v1501_v8 }
  0x10   :  { %122 = vmatpush.bf16.msra.mxu1 %v1493_v13 }
  0x13   :  { %1522 = vmatmul.msk.bf16.vlgmr.msra.gmra.mxu1 %vm108_vm0, %v52_v19 }
  0x14   :  { %138 = vmatpush.bf16.msrb.mxu1 %v1521_v16 }
  0x18   :  { %139 = vmatpush.bf16.msrb.mxu1 %v1513_v20 }
  0x1c   :  { %140 = vmatpush.bf16.msrb.mxu1 %v1505_v23 }
  0x20   :  { %141 = vmatpush.bf16.msrb.mxu1 %v1497_v26 }
  0x23   :  { %1523 = vmatmul.msk.bf16.gmra.mxu1 %vm108_vm0, %v53_v29 }
  0x33   :  { %1524 = vmatmul.msk.bf16.vlgmr.msrb.gmra.mxu1 %vm108_vm0, %v52_v19 }
  0x43   :  { %1525 = vmatmul.msk.bf16.gmra.mxu1 %vm108_vm0, %v53_v29 }
  0x90   :  { %v124_v32 = vpop.f32.mrf.mxu1 }
  0x91   :  { %v1987_v33 = vadd.f32 %v124_v32, %v64_v31 }
  0x93   :  { %450 = vrot.lane.b32.xlu2 %v1987_v33, %s1837_s22 }
  0x98   :  { %v126_v34 = vpop.f32.mrf.mxu1 }
  0x99   :  { %v1991_v35 = vadd.f32 %v126_v34, %v64_v31 }
  0x9b   :  { %456 = vrot.lane.b32.xlu1 %v1991_v35, %s1838_s23  ;;  %158 = vrot.lane.b32.xlu0 %v1991_v35, %s1839_s24 }
  0x9c   :  { %452 = vrot.lane.b32.xlu2 %v1991_v35, %s1837_s22 }
  0xa0   :  { %v129_v36 = vpop.f32.mrf.mxu1 }
  0xa1   :  { %v1999_v37 = vadd.f32 %v129_v36, %v64_v31 }
  0xa3   :  { %454 = vrot.lane.b32.xlu1 %v1987_v33, %s1838_s23  ;;  %156 = vrot.lane.b32.xlu0 %v1987_v33, %s1839_s24 }
  0xa4   :  { %254 = vrot.lane.b32.xlu2 %v1991_v35, %s1840_s3 }
  0xa8   :  { %v131_v38 = vpop.f32.mrf.mxu1 }
  0xa9   :  { %v2007_v39 = vadd.f32 %v131_v38, %v64_v31 }
  0xab   :  { %248 = vrot.lane.b32.xlu1 %v1987_v33, %s1841_s25  ;;  %252 = vrot.lane.b32.xlu0 %v1987_v33, %s1840_s3 }
  0xb0   :  { %v143_v40 = vpop.f32.mrf.mxu1 }
  0xb1   :  { %v144_v43 = vadd.f32 %v143_v40, %v2013_v41 }
  0xb8   :  { %v145_v42 = vpop.f32.mrf.mxu1 }
  0xb9   :  { %v146_v44 = vadd.f32 %v145_v42, %v2013_v41 }
  0xbb   :  { %239 = vmatpush.msra.mxu3 %v146_v44  ;;  %v2046_v2 = vpack.i.bf16 %v144_v43, %v146_v44 }
  0xbd   :  { %240 = vmatpush.msra.mxu3 %v144_v43 }
  0xed   :  { %v451_v45 = vpop.permute.xlu2 %450 }
  0xf6   :  { %v453_v46 = vpop.permute.xlu2 %452 }
  0xfe   :  { %v255_v47 = vpop.permute.xlu2 %254 }
  0xff   :  { %1532 = vmatpush.xpose.msk.msrb.mxu3 %vm160_vm1, %v255_v47 }
 0x10d   :  { %v457_v48 = vpop.permute.xlu1 %456  ;;  %v159_v49 = vpop.permute.xlu0 %158 }
 0x10e   :  { %1526 = vmatpush.xpose.msk.msra.mxu2 %vm160_vm1, %v159_v49  ;;  %1544 = vmatpush.xpose.msk.msra.mxu0 %vm160_vm1, %v457_v48 }
 0x115   :  { %v455_v50 = vpop.permute.xlu1 %454  ;;  %v157_v51 = vpop.permute.xlu0 %156 }
 0x116   :  { %1527 = vmatpush.xpose.msk.msra.mxu2 %vm160_vm1, %v157_v51  ;;  %1545 = vmatpush.xpose.msk.msra.mxu0 %vm160_vm1, %v455_v50 }
 0x119   :  { %1528 = vmatmul.msk.f32.vlgmr.msra.gmra.mxu2 %vm160_vm1, %v1987_v33  ;;  %1546 = vmatmul.msk.f32.vlgmr.msra.gmra.mxu0 %vm160_vm1, %v451_v45 }
 0x11d   :  { %v253_v52 = vpop.permute.xlu0 %252  ;;  %v2060_v7 = vpop.permute.xlu1 %248 }
 0x11e   :  { %1533 = vmatpush.xpose.msk.msrb.mxu3 %vm160_vm1, %v253_v52 }
 0x121   :  { %1529 = vmatmul.msk.f32.gmra.mxu2 %vm160_vm1, %v1991_v35  ;;  %1547 = vmatmul.msk.f32.gmra.mxu0 %vm160_vm1, %v453_v46 }
 0x196   :  { %v483_v54 = vpop.f32.mrf.mxu0 }
 0x197   :  { %v489_v55 = vmul.f32 0.25, %v483_v54 }
 0x199   :  { %v491_v56 = vadd.f32 %v2032_v53, %v489_v55 }
 0x19b   :  { %v493_v57 = vsel %vm160_vm1, %v491_v56, -inf }
 0x19c   :  { %494 = vmax.xlane.f32.xlu2 %v493_v57  ;;  %v186_v58 = vpop.f32.mrf.mxu2 }
 0x19d   :  { %v192_v59 = vmul.f32 0.25, %v186_v58 }
 0x19e   :  { %v486_v3 = vpop.f32.mrf.mxu0 }
 0x19f   :  { %v195_v60 = vadd.f32 %v2032_v53, %v192_v59  ;;  %v490_v4 = vmul.f32 0.25, %v486_v3 }
 0x1a1   :  { %v197_v61 = vsel %vm160_vm1, %v195_v60, -inf  ;;  %v492_v5 = vadd.f32 %v2032_v53, %v490_v4 }
 0x1a2   :  { %198 = vmax.xlane.f32.xlu0 %v197_v61 }
 0x1a3   :  { %v496_v6 = vsel %vm160_vm1, %v492_v5, -inf }
 0x1a4   :  { %v189_v62 = vpop.f32.mrf.mxu2 }
 0x1a5   :  { %v193_v63 = vmul.f32 0.25, %v189_v62 }
 0x1a7   :  { %v196_v0 = vadd.f32 %v2032_v53, %v193_v63 }
 0x1a9   :  { %v200_v1 = vsel %vm160_vm1, %v196_v0, -inf }
 0x1aa   :  { %201 = vmax.xlane.f32.xlu1 %v200_v1 }
 0x1b6   :  { %250 = vrot.lane.b32.xlu0 %v1991_v35, %s1841_s25 }
 0x1c3   :  { %354 = vrot.lane.b32.xlu1 %v1987_v33, %s1842_s28 }
 0x1cb   :  { %352 = vrot.lane.b32.xlu1 %v1991_v35, %s1843_s29 }
 0x1d3   :  { %1675 = vrot.lane.b32.xlu1 %v2046_v2, %s1837_s22 }
 0x1db   :  { %585 = vrot.lane.b32.xlu1 %v1999_v37, %s1839_s24 }
 0x1e0   :  { %497 = vmax.xlane.f32.xlu0 %v496_v6 }
 0x1e3   :  { %682 = vrot.lane.b32.xlu1 %v2007_v39, %s1840_s3 }
 0x1f4   :  { %350 = vrot.lane.b32.xlu0 %v1987_v33, %s1843_s29 }
 0x1fc   :  { %587 = vrot.lane.b32.xlu0 %v2007_v39, %s1839_s24 }
 0x20f   :  { %v495_v25 = vpop.xlane.xlu2 %494 }
 0x210   :  { %v499_v26 = vsub.f32 %v491_v56, %v495_v25 }
 0x212   :  { %v501_v29 = vmul.f32 1.442695, %v499_v26 }
 0x215   :  { %v199_v8 = vpop.xlane.xlu0 %198 }
 0x216   :  { %v203_v9 = vsub.f32 %v195_v60, %v199_v8 }
 0x218   :  { %v205_v10 = vmul.f32 1.442695, %v203_v9 }
 0x21a   :  { %1743 = vpow2.f32 %v205_v10 }
 0x21d   :  { %v202_v11 = vpop.xlane.xlu1 %201 }
 0x21e   :  { %v204_v12 = vsub.f32 %v196_v0, %v202_v11 }
 0x220   :  { %v1744_v13 = vpop.eup %1743  ;;  %v207_v14 = vmul.f32 1.442695, %v204_v12 }
 0x221   :  { %v209_v15 = vsel %vm160_vm1, %v1744_v13, 0.0 }
 0x222   :  { %1745 = vpow2.f32 %v207_v14  ;;  %210 = vadd.xlane.f32.xlu2 %v209_v15 }
 0x228   :  { %v1746_v16 = vpop.eup %1745  ;;  %v251_v23 = vpop.permute.xlu0 %250 }
 0x229   :  { %v212_v17 = vsel %vm160_vm1, %v1746_v16, 0.0 }
 0x22a   :  { %213 = vadd.xlane.f32.xlu1 %v212_v17 }
 0x235   :  { %v355_v18 = vpop.permute.xlu1 %354 }
 0x23a   :  { %356 = vrot.lane.b32.xlu2 %v1991_v35, %s1842_s28 }
 0x23d   :  { %v353_v19 = vpop.permute.xlu1 %352 }
 0x243   :  { %784 = vrot.lane.b32.xlu1 %v2007_v39, %s1842_s28 }
 0x245   :  { %v1676_v20 = vpop.permute.xlu1 %1675 }
 0x246   :  { %v1677_v21 = vunpack.i.l.bf16 %v1676_v20  ;;  %v1678_v22 = vunpack.i.h.bf16 %v1676_v20 }
 0x248   :  { %541 = vmatpush.msrb.mxu0 %v1677_v21 }
 0x24a   :  { %542 = vmatpush.msrb.mxu0 %v1678_v22 }
 0x24b   :  { %676 = vrot.lane.b32.xlu1 %v1999_v37, %s1841_s25 }
 0x24d   :  { %v586_v24 = vpop.permute.xlu1 %585 }
 0x253   :  { %782 = vrot.lane.b32.xlu1 %v1999_v37, %s1842_s28  ;;  %v498_v27 = vpop.xlane.xlu0 %497 }
 0x254   :  { %v500_v28 = vsub.f32 %v492_v5, %v498_v27 }
 0x255   :  { %v683_v30 = vpop.permute.xlu1 %682 }
 0x256   :  { %v503_v31 = vmul.f32 1.442695, %v500_v28  ;;  %1556 = vmatpush.xpose.msk.msra.mxu0 %vm160_vm1, %v683_v30 }
 0x258   :  { %1747 = vpow2.f32 %v503_v31 }
 0x259   :  { %1749 = vpow2.f32 %v501_v29 }
 0x25b   :  { %678 = vrot.lane.b32.xlu1 %v2007_v39, %s1841_s25 }
 0x25e   :  { %v1748_v32 = vpop.eup %1747 }
 0x25f   :  { %v1750_v33 = vpop.eup %1749  ;;  %v508_v34 = vsel %vm160_vm1, %v1748_v32, 0.0 }
 0x260   :  { %509 = vadd.xlane.f32.xlu0 %v508_v34  ;;  %v505_v35 = vsel %vm160_vm1, %v1750_v33, 0.0 }
 0x263   :  { %780 = vrot.lane.b32.xlu1 %v2007_v39, %s1843_s29  ;;  %506 = vadd.xlane.f32.xlu2 %v505_v35 }
 0x266   :  { %v351_v45 = vpop.permute.xlu0 %350 }
 0x26b   :  { %878 = vrot.lane.b32.xlu1 %v1999_v37, %s1837_s22 }
 0x26e   :  { %v588_v47 = vpop.permute.xlu0 %587 }
 0x274   :  { %778 = vrot.lane.b32.xlu0 %v1999_v37, %s1843_s29 }
 0x27b   :  { %680 = vrot.lane.b32.xlu2 %v1999_v37, %s1840_s3 }
 0x27c   :  { %880 = vrot.lane.b32.xlu0 %v2007_v39, %s1837_s22 }
 0x283   :  { %884 = vrot.lane.b32.xlu2 %v2007_v39, %s1838_s23 }
 0x28b   :  { %882 = vrot.lane.b32.xlu2 %v1999_v37, %s1838_s23 }
 0x295   :  { %v211_v36 = vpop.xlane.xlu2 %210 }
 0x296   :  { %1751 = vrcp.f32 %v211_v36 }
 0x29c   :  { %v1752_v38 = vpop.eup %1751 }
 0x29d   :  { %v214_v40 = vpop.xlane.xlu1 %213  ;;  %v357_v42 = vpop.permute.xlu2 %356  ;;  %v217_v43 = vmul.f32 %v1752_v38, %v1744_v13 }
 0x29e   :  { %1753 = vrcp.f32 %v214_v40 }
 0x29f   :  { %1530 = vmatmul.msk.f32.vlgmr.msra.gmra.mxu3 %vm160_vm1, %v217_v43 }
 0x2a0   :  { %1538 = vmatpush.xpose.msk.msra.mxu3 %vm160_vm1, %v357_v42 }
 0x2a4   :  { %v1754_v44 = vpop.eup %1753  ;;  %1539 = vmatpush.xpose.msk.msra.mxu3 %vm160_vm1, %v355_v18  ;;  %v1735_v18 = vld [vmem:[%s2445_s1 + $0x1] ss:$0 sm:$0xff] }
 0x2a5   :  { %v218_v46 = vmul.f32 %v1754_v44, %v1746_v16 }
 0x2a7   :  { %1531 = vmatmul.msk.f32.gmra.mxu3 %vm160_vm1, %v218_v46 }
 0x2af   :  { %1534 = vmatmul.msk.f32.vlgmr.msrb.gmra.mxu3 %vm160_vm1, %v2060_v7 }
 0x2b0   :  { %1550 = vmatpush.xpose.msk.msrb.mxu3 %vm160_vm1, %v588_v47 }
 0x2b4   :  { %1551 = vmatpush.xpose.msk.msrb.mxu3 %vm160_vm1, %v586_v24 }
 0x2b5   :  { %v785_v48 = vpop.permute.xlu1 %784 }
 0x2b7   :  { %1535 = vmatmul.msk.f32.gmra.mxu3 %vm160_vm1, %v251_v23 }
 0x2bd   :  { %v677_v49 = vpop.permute.xlu1 %676 }
 0x2bf   :  { %1540 = vmatmul.msk.f32.vlgmr.msra.gmra.mxu3 %vm160_vm1, %v351_v45 }
 0x2c0   :  { %1562 = vmatpush.xpose.msk.msra.mxu3 %vm160_vm1, %v785_v48 }
 0x2c5   :  { %v783_v50 = vpop.permute.xlu1 %782 }
 0x2c6   :  { %1563 = vmatpush.xpose.msk.msra.mxu3 %vm160_vm1, %v783_v50 }
 0x2c7   :  { %1541 = vmatmul.msk.f32.gmra.mxu3 %vm160_vm1, %v353_v19 }
 0x2cd   :  { %v679_v58 = vpop.permute.xlu1 %678 }
 0x2cf   :  { %1552 = vmatmul.msk.f32.vlgmr.msrb.gmra.mxu3 %vm160_vm1, %v1999_v37 }
 0x2d3   :  { %v510_v52 = vpop.xlane.xlu0 %509 }
 0x2d5   :  { %v781_v37 = vpop.permute.xlu1 %780 }
 0x2d6   :  { %v507_v51 = vpop.xlane.xlu2 %506 }
 0x2d7   :  { %1755 = vrcp.f32 %v507_v51  ;;  %1553 = vmatmul.msk.f32.gmra.mxu3 %vm160_vm1, %v2007_v39 }
 0x2d8   :  { %1757 = vrcp.f32 %v510_v52 }
 0x2dd   :  { %v1756_v54 = vpop.eup %1755  ;;  %v879_v62 = vpop.permute.xlu1 %878 }
 0x2de   :  { %v681_v55 = vpop.permute.xlu2 %680  ;;  %v513_v56 = vmul.f32 %v1756_v54, %v1750_v33  ;;  %v1758_v57 = vpop.eup %1757 }
 0x2df   :  { %1557 = vmatpush.xpose.msk.msra.mxu0 %vm160_vm1, %v681_v55  ;;  %v514_v61 = vmul.f32 %v1758_v57, %v1748_v32 }
 0x2e0   :  { %1548 = vmatmul.msk.f32.vlgmr.msrb.gmra.mxu0 %vm160_vm1, %v513_v56 }
 0x2e6   :  { %v885_v59 = vpop.permute.xlu2 %884  ;;  %v779_v60 = vpop.permute.xlu0 %778 }
 0x2e7   :  { %1564 = vmatmul.msk.f32.vlgmr.msra.gmra.mxu3 %vm160_vm1, %v779_v60  ;;  %1568 = vmatpush.xpose.msk.msrb.mxu0 %vm160_vm1, %v885_v59 }
 0x2e8   :  { %1549 = vmatmul.msk.f32.gmra.mxu0 %vm160_vm1, %v514_v61 }
 0x2ee   :  { %v883_v39 = vpop.permute.xlu2 %882  ;;  %v881_v63 = vpop.permute.xlu0 %880 }
 0x2ef   :  { %1565 = vmatmul.msk.f32.gmra.mxu3 %vm160_vm1, %v781_v37  ;;  %1569 = vmatpush.xpose.msk.msrb.mxu0 %vm160_vm1, %v883_v39 }
 0x2f0   :  { %1558 = vmatmul.msk.f32.vlgmr.msra.gmra.mxu0 %vm160_vm1, %v677_v49 }
 0x2f8   :  { %1559 = vmatmul.msk.f32.gmra.mxu0 %vm160_vm1, %v679_v58 }
 0x300   :  { %1570 = vmatmul.msk.f32.vlgmr.msrb.gmra.mxu0 %vm160_vm1, %v879_v62 }
 0x308   :  { %1571 = vmatmul.msk.f32.gmra.mxu0 %vm160_vm1, %v881_v63 }
 0x322   :  { %v2119_v0 = vpop.f32.mrf.mxu3 }
 0x32a   :  { %v2121_v1 = vpop.f32.mrf.mxu3 }
 0x332   :  { %v281_v3 = vpop.f32.mrf.mxu3 }
 0x333   :  { %v287_v4 = vmul.f32 0.25, %v281_v3 }
 0x335   :  { %v289_v5 = vadd.f32 %v2032_v53, %v287_v4 }
 0x337   :  { %v291_v6 = vsel %vm160_vm1, %v289_v5, -inf }
 0x338   :  { %292 = vmax.xlane.f32.xlu2 %v291_v6 }
 0x33a   :  { %v284_v7 = vpop.f32.mrf.mxu3 }
 0x33b   :  { %v288_v32 = vmul.f32 0.25, %v284_v7 }
 0x33d   :  { %v290_v38 = vadd.f32 %v2032_v53, %v288_v32 }
 0x33f   :  { %v294_v44 = vsel %vm160_vm1, %v290_v38, -inf }
 0x342   :  { %v383_v8 = vpop.f32.mrf.mxu3 }
 0x343   :  { %v389_v20 = vmul.f32 0.25, %v383_v8 }
 0x345   :  { %v2143_v24 = vadd.f32 %v2032_v53, %v389_v20 }
 0x347   :  { %v393_v26 = vsel %vm160_vm1, %v2143_v24, -inf }
 0x34a   :  { %v386_v9 = vpop.f32.mrf.mxu3 }
 0x34b   :  { %v390_v10 = vmul.f32 0.25, %v386_v9 }
 0x34d   :  { %v2126_v11 = vadd.f32 %v2032_v53, %v390_v10  ;;  %v148_v10 = vpop.f32.mrf.mxu1 }
 0x34f   :  { %v396_v12 = vsel %vm160_vm1, %v2126_v11, -inf }
 0x350   :  { %397 = vmax.xlane.f32.xlu2 %v396_v12 }
 0x352   :  { %v614_v28 = vpop.f32.mrf.mxu3 }
 0x353   :  { %v620_v43 = vmul.f32 0.25, %v614_v28 }
 0x355   :  { %v623_v47 = vadd.f32 %v1735_v18, %v620_v43 }
 0x357   :  { %v625_v49 = vsel %vm160_vm1, %v623_v47, -inf }
 0x35a   :  { %v617_v34 = vpop.f32.mrf.mxu3 }
 0x35b   :  { %v621_v40 = vmul.f32 0.25, %v617_v34 }
 0x35d   :  { %v2130_v13 = vpop.f32.mrf.mxu0  ;;  %v624_v46 = vadd.f32 %v1735_v18, %v621_v40 }
 0x35f   :  { %v628_v48 = vsel %vm160_vm1, %v624_v46, -inf }
 0x365   :  { %v2132_v14 = vpop.f32.mrf.mxu0 }
 0x366   :  { %v1714_v15 = vpack.i.bf16 %v2132_v14, %v2130_v13  ;;  %v1652_v13 = vld [vmem:[%s2446_s4 + $0x10] sm:$0xff] }
 0x368   :  { %1680 = vrot.lane.b32.xlu2 %v2046_v2, %s1841_s25 }
 0x36a   :  { %v811_v55 = vpop.f32.mrf.mxu3 }
 0x36b   :  { %v817_v56 = vmul.f32 0.25, %v811_v55 }
 0x36d   :  { %v709_v16 = vpop.f32.mrf.mxu0  ;;  %v2169_v58 = vadd.f32 %v1735_v18, %v817_v56 }
 0x36e   :  { %v715_v17 = vmul.f32 0.25, %v709_v16 }
 0x370   :  { %v717_v19 = vadd.f32 %v1735_v18, %v715_v17 }
 0x372   :  { %v719_v21 = vsel %vm160_vm1, %v717_v19, -inf  ;;  %v814_v59 = vpop.f32.mrf.mxu3 }
 0x373   :  { %720 = vmax.xlane.f32.xlu0 %v719_v21  ;;  %v818_v60 = vmul.f32 0.25, %v814_v59 }
 0x375   :  { %v712_v22 = vpop.f32.mrf.mxu0  ;;  %v2173_v39 = vadd.f32 %v1735_v18, %v818_v60 }
 0x376   :  { %v716_v23 = vmul.f32 0.25, %v712_v22 }
 0x377   :  { %v824_v63 = vsel %vm160_vm1, %v2173_v39, -inf }
 0x378   :  { %v2145_v25 = vadd.f32 %v1735_v18, %v716_v23 }
 0x37a   :  { %v722_v27 = vsel %vm160_vm1, %v2145_v25, -inf }
 0x37b   :  { %394 = vmax.xlane.f32.xlu0 %v393_v26  ;;  %723 = vmax.xlane.f32.xlu1 %v722_v27  ;;  %v150_v26 = vpop.f32.mrf.mxu1 }
 0x37d   :  { %v911_v29 = vpop.f32.mrf.mxu0 }
 0x37e   :  { %v917_v30 = vmul.f32 0.25, %v911_v29 }
 0x380   :  { %v2151_v31 = vadd.f32 %v1735_v18, %v917_v30 }
 0x382   :  { %v921_v33 = vsel %vm160_vm1, %v2151_v31, -inf }
 0x383   :  { %922 = vmax.xlane.f32.xlu1 %v921_v33 }
 0x385   :  { %v914_v35 = vpop.f32.mrf.mxu0 }
 0x386   :  { %v918_v36 = vmul.f32 0.25, %v914_v35  ;;  %v151_v35 = vadd.f32 %v150_v26, %v2013_v41 }
 0x388   :  { %v2156_v42 = vadd.f32 %v1735_v18, %v918_v36 }
 0x38a   :  { %v924_v45 = vsel %vm160_vm1, %v2156_v42, -inf }
 0x38b   :  { %295 = vmax.xlane.f32.xlu1 %v294_v44  ;;  %925 = vmax.xlane.f32.xlu0 %v924_v45 }
 0x391   :  { %629 = vmax.xlane.f32.xlu2 %v628_v48 }
 0x393   :  { %626 = vmax.xlane.f32.xlu1 %v625_v49 }
 0x39f   :  { %1685 = vrot.lane.b32.xlu0 %v2046_v2, %s1843_s29  ;;  %v821_v2 = vsel %vm160_vm1, %v2169_v58, -inf }
 0x3ab   :  { %v293_v53 = vpop.xlane.xlu2 %292 }
 0x3ac   :  { %v297_v50 = vsub.f32 %v289_v5, %v293_v53 }
 0x3ae   :  { %v299_v51 = vmul.f32 1.442695, %v297_v50 }
 0x3b0   :  { %1759 = vpow2.f32 %v299_v51 }
 0x3b6   :  { %v2165_v52 = vpop.eup %1759 }
 0x3b7   :  { %v303_v54 = vsel %vm160_vm1, %v2165_v52, 0.0 }
 0x3b8   :  { %304 = vadd.xlane.f32.xlu2 %v303_v54 }
 0x3c3   :  { %v398_v57 = vpop.xlane.xlu2 %397 }
 0x3c4   :  { %v400_v29 = vsub.f32 %v2126_v11, %v398_v57 }
 0x3c6   :  { %v403_v40 = vmul.f32 1.442695, %v400_v29 }
 0x3c9   :  { %822 = vmax.xlane.f32.xlu0 %v821_v2 }
 0x3cb   :  { %v1681_v61 = vpop.permute.xlu2 %1680 }
 0x3cc   :  { %v1682_v37 = vunpack.i.l.bf16 %v1681_v61  ;;  %v1683_v62 = vunpack.i.h.bf16 %v1681_v61 }
 0x3ce   :  { %341 = vmatpush.msrb.mxu2 %v1682_v37 }
 0x3d0   :  { %342 = vmatpush.msrb.mxu2 %v1683_v62 }
 0x3d1   :  { %825 = vmax.xlane.f32.xlu0 %v824_v63 }
 0x3e6   :  { %v721_v3 = vpop.xlane.xlu0 %720 }
 0x3e7   :  { %v725_v4 = vsub.f32 %v717_v19, %v721_v3 }
 0x3e9   :  { %v727_v5 = vmul.f32 1.442695, %v725_v4 }
 0x3eb   :  { %1761 = vpow2.f32 %v727_v5 }
 0x3ee   :  { %v2177_v6 = vpop.xlane.xlu1 %723  ;;  %v395_v12 = vpop.xlane.xlu0 %394 }
 0x3ef   :  { %v399_v18 = vsub.f32 %v2143_v24, %v395_v12  ;;  %v149_v24 = vadd.f32 %v148_v10, %v2013_v41 }
 0x3f1   :  { %v2179_v7 = vpop.eup %1761  ;;  %v401_v19 = vmul.f32 1.442695, %v399_v18 }
 0x3f2   :  { %v731_v8 = vsel %vm160_vm1, %v2179_v7, 0.0 }
 0x3f3   :  { %732 = vadd.xlane.f32.xlu1 %v731_v8 }
 0x3f6   :  { %v923_v9 = vpop.xlane.xlu1 %922 }
 0x3f7   :  { %v927_v30 = vsub.f32 %v2151_v31, %v923_v9 }
 0x3f9   :  { %v929_v11 = vmul.f32 1.442695, %v927_v30 }
 0x3fe   :  { %v296_v16 = vpop.xlane.xlu1 %295  ;;  %v926_v33 = vpop.xlane.xlu0 %925 }
 0x3ff   :  { %v298_v17 = vsub.f32 %v290_v38, %v296_v16  ;;  %v1699_v38 = vpack.i.bf16 %v149_v24, %v151_v35  ;;  %v928_v60 = vsub.f32 %v2156_v42, %v926_v33  ;;  %v726_v42 = vsub.f32 %v2145_v25, %v2177_v6 }
 0x401   :  { %v301_v20 = vmul.f32 1.442695, %v298_v17  ;;  %v931_v37 = vmul.f32 1.442695, %v928_v60  ;;  %v729_v9 = vmul.f32 1.442695, %v726_v42 }
 0x403   :  { %1763 = vpow2.f32 %v301_v20 }
 0x404   :  { %v630_v21 = vpop.xlane.xlu2 %629  ;;  %1765 = vpow2.f32 %v401_v19 }
 0x405   :  { %v632_v22 = vsub.f32 %v624_v46, %v630_v21 }
 0x406   :  { %v627_v23 = vpop.xlane.xlu1 %626 }
 0x407   :  { %v635_v27 = vmul.f32 1.442695, %v632_v22  ;;  %v631_v28 = vsub.f32 %v623_v47, %v627_v23 }
 0x409   :  { %v2186_v32 = vpop.eup %1763  ;;  %1767 = vpow2.f32 %v635_v27  ;;  %v633_v34 = vmul.f32 1.442695, %v631_v28 }
 0x40a   :  { %v306_v36 = vsel %vm160_vm1, %v2186_v32, 0.0  ;;  %v2192_v43 = vpop.eup %1765 }
 0x40b   :  { %1769 = vpow2.f32 %v633_v34  ;;  %307 = vadd.xlane.f32.xlu1 %v306_v36  ;;  %v405_v48 = vsel %vm160_vm1, %v2192_v43, 0.0 }
 0x40c   :  { %1771 = vpow2.f32 %v403_v40 }
 0x40d   :  { %1773 = vpow2.f32 %v929_v11 }
 0x40f   :  { %v2194_v31 = vpop.eup %1767 }
 0x410   :  { %v640_v44 = vsel %vm160_vm1, %v2194_v31, 0.0 }
 0x411   :  { %v2198_v45 = vpop.eup %1769  ;;  %641 = vadd.xlane.f32.xlu0 %v640_v44  ;;  %v1686_v41 = vpop.permute.xlu0 %1685 }
 0x412   :  { %v1687_v46 = vunpack.i.l.bf16 %v1686_v41  ;;  %v637_v47 = vsel %vm160_vm1, %v2198_v45, 0.0  ;;  %v1688_v49 = vunpack.i.h.bf16 %v1686_v41  ;;  %v1772_v53 = vpop.eup %1771 }
 0x413   :  { %638 = vadd.xlane.f32.xlu2 %v637_v47  ;;  %406 = vadd.xlane.f32.xlu1 %v405_v48  ;;  %v2204_v50 = vpop.eup %1773  ;;  %v408_v54 = vsel %vm160_vm1, %v1772_v53, 0.0 }
 0x414   :  { %441 = vmatpush.msra.mxu2 %v1687_v46  ;;  %v933_v51 = vsel %vm160_vm1, %v2204_v50, 0.0 }
 0x416   :  { %442 = vmatpush.msra.mxu2 %v1688_v49 }
 0x41b   :  { %934 = vadd.xlane.f32.xlu2 %v933_v51  ;;  %409 = vadd.xlane.f32.xlu1 %v408_v54 }
 0x425   :  { %1695 = vrot.lane.b32.xlu0 %v1699_v38, %s1843_s29 }
 0x42b   :  { %v305_v55 = vpop.xlane.xlu2 %304 }
 0x42c   :  { %1775 = vrcp.f32 %v305_v55 }
 0x432   :  { %v1776_v56 = vpop.eup %1775 }
 0x433   :  { %v311_v57 = vmul.f32 %v1776_v56, %v2165_v52 }
 0x434   :  { %1690 = vrot.lane.b32.xlu1 %v1699_v38, %s1841_s25 }
 0x435   :  { %1536 = vmatmul.msk.f32.vlgmr.msrb.gmra.mxu2 %vm160_vm1, %v311_v57 }
 0x436   :  { %667 = vmatpush.msrb.mxu2 %v151_v35 }
 0x438   :  { %668 = vmatpush.msrb.mxu2 %v149_v24 }
 0x43c   :  { %v823_v59 = vpop.xlane.xlu0 %822 }
 0x43d   :  { %v827_v2 = vsub.f32 %v2169_v58, %v823_v59 }
 0x43f   :  { %v829_v61 = vmul.f32 1.442695, %v827_v2 }
 0x441   :  { %1777 = vpow2.f32 %v829_v61 }
 0x442   :  { %1779 = vpow2.f32 %v931_v37 }
 0x444   :  { %v826_v62 = vpop.xlane.xlu0 %825 }
 0x445   :  { %v828_v63 = vsub.f32 %v2173_v39, %v826_v62 }
 0x447   :  { %v1778_v3 = vpop.eup %1777  ;;  %v831_v52 = vmul.f32 1.442695, %v828_v63 }
 0x448   :  { %v833_v4 = vsel %vm160_vm1, %v1778_v3, 0.0  ;;  %v2217_v5 = vpop.eup %1779 }
 0x449   :  { %1781 = vpow2.f32 %v831_v52  ;;  %834 = vadd.xlane.f32.xlu2 %v833_v4  ;;  %v936_v58 = vsel %vm160_vm1, %v2217_v5, 0.0 }
 0x44a   :  { %1783 = vpow2.f32 %v729_v9  ;;  %v1653_v9 = vld [vmem:[%s2446_s4 + $0x18] sm:$0xff] }
 0x44b   :  { %1056 = vmatpush.bf16.msrb.mxu3 %v1653_v9 }
 0x44f   :  { %v1782_v8 = vpop.eup %1781  ;;  %937 = vadd.xlane.f32.xlu0 %v936_v58  ;;  %1057 = vmatpush.bf16.msrb.mxu3 %v1652_v13 }
 0x450   :  { %v836_v10 = vsel %vm160_vm1, %v1782_v8, 0.0  ;;  %v2224_v39 = vpop.eup %1783 }
 0x451   :  { %837 = vadd.xlane.f32.xlu2 %v836_v10  ;;  %v734_v12 = vsel %vm160_vm1, %v2224_v39, 0.0 }
 0x45e   :  { %735 = vadd.xlane.f32.xlu1 %v734_v12 }
 0x466   :  { %v733_v16 = vpop.xlane.xlu1 %732 }
 0x469   :  { %1700 = vrot.lane.b32.xlu2 %v1699_v38, %s1837_s22 }
 0x47e   :  { %v308_v25 = vpop.xlane.xlu1 %307 }
 0x47f   :  { %1785 = vrcp.f32 %v308_v25 }
 0x484   :  { %v642_v21 = vpop.xlane.xlu0 %641 }
 0x485   :  { %v1786_v6 = vpop.eup %1785 }
 0x486   :  { %v407_v17 = vpop.xlane.xlu1 %406  ;;  %v312_v18 = vmul.f32 %v1786_v6, %v2186_v32  ;;  %v639_v23 = vpop.xlane.xlu2 %638 }
 0x487   :  { %1787 = vrcp.f32 %v407_v17 }
 0x488   :  { %1537 = vmatmul.msk.f32.gmra.mxu2 %vm160_vm1, %v312_v18 }
 0x48d   :  { %v1788_v20 = vpop.eup %1787 }
 0x48e   :  { %v410_v19 = vpop.xlane.xlu1 %409  ;;  %v413_v22 = vmul.f32 %v1788_v20, %v2192_v43  ;;  %v935_v43 = vpop.xlane.xlu2 %934 }
 0x48f   :  { %1789 = vrcp.f32 %v410_v19 }
 0x490   :  { %1542 = vmatmul.msk.f32.vlgmr.msra.gmra.mxu2 %vm160_vm1, %v413_v22  ;;  %1791 = vrcp.f32 %v639_v23 }
 0x491   :  { %1793 = vrcp.f32 %v642_v21 }
 0x492   :  { %1795 = vrcp.f32 %v733_v16 }
 0x495   :  { %v1790_v26 = vpop.eup %1789 }
 0x496   :  { %v414_v27 = vmul.f32 %v1790_v26, %v1772_v53  ;;  %v1792_v32 = vpop.eup %1791 }
 0x497   :  { %v1696_v28 = vpop.permute.xlu0 %1695  ;;  %v645_v33 = vmul.f32 %v1792_v32, %v2198_v45  ;;  %v1794_v34 = vpop.eup %1793 }
 0x498   :  { %v1698_v29 = vunpack.i.h.bf16 %v1696_v28  ;;  %v1697_v30 = vunpack.i.l.bf16 %v1696_v28  ;;  %1543 = vmatmul.msk.f32.gmra.mxu2 %vm160_vm1, %v414_v27  ;;  %v1796_v35 = vpop.eup %1795  ;;  %v646_v38 = vmul.f32 %v1794_v34, %v2194_v31 }
 0x499   :  { %v739_v11 = vmul.f32 %v1796_v35, %v2179_v7 }
 0x49a   :  { %869 = vmatpush.msra.mxu2 %v1697_v30 }
 0x49c   :  { %870 = vmatpush.msra.mxu2 %v1698_v29 }
 0x4a0   :  { %1554 = vmatmul.msk.f32.vlgmr.msrb.gmra.mxu2 %vm160_vm1, %v645_v33 }
 0x4a6   :  { %v1691_v24 = vpop.permute.xlu1 %1690 }
 0x4a7   :  { %v1692_v36 = vunpack.i.l.bf16 %v1691_v24  ;;  %v1693_v40 = vunpack.i.h.bf16 %v1691_v24 }
 0x4a8   :  { %1555 = vmatmul.msk.f32.gmra.mxu2 %vm160_vm1, %v646_v38 }
 0x4a9   :  { %769 = vmatpush.msra.mxu1 %v1692_v36 }
 0x4ab   :  { %770 = vmatpush.msra.mxu1 %v1693_v40 }
 0x4ac   :  { %1560 = vmatmul.msk.f32.vlgmr.msra.gmra.mxu1 %vm160_vm1, %v739_v11 }
 0x4b8   :  { %v344_v2 = vpop.f32.mrf.mxu2 }
 0x4bc   :  { %v835_v44 = vpop.xlane.xlu2 %834 }
 0x4bd   :  { %1797 = vrcp.f32 %v835_v44 }
 0x4c2   :  { %v938_v55 = vpop.xlane.xlu0 %937 }
 0x4c3   :  { %v1798_v45 = vpop.eup %1797 }
 0x4c4   :  { %v841_v41 = vmul.f32 %v1798_v45, %v1778_v3  ;;  %v838_v46 = vpop.xlane.xlu2 %837 }
 0x4c5   :  { %1799 = vrcp.f32 %v838_v46 }
 0x4c6   :  { %1566 = vmatmul.msk.f32.vlgmr.msra.gmra.mxu2 %vm160_vm1, %v841_v41 }
 0x4cb   :  { %v1800_v47 = vpop.eup %1799 }
 0x4cc   :  { %v1701_v31 = vpop.permute.xlu2 %1700  ;;  %v842_v48 = vmul.f32 %v1800_v47, %v1782_v8 }
 0x4cd   :  { %v1702_v49 = vunpack.i.l.bf16 %v1701_v31  ;;  %v1703_v53 = vunpack.i.h.bf16 %v1701_v31 }
 0x4ce   :  { %1567 = vmatmul.msk.f32.gmra.mxu2 %vm160_vm1, %v842_v48  ;;  %v1736_v48 = vld [vmem:[%s2447_s5] ss:$0 sm:$0xff] }
 0x4cf   :  { %969 = vmatpush.msrb.mxu1 %v1702_v49 }
 0x4d1   :  { %v736_v7 = vpop.xlane.xlu1 %735  ;;  %970 = vmatpush.msrb.mxu1 %v1703_v53 }
 0x4d2   :  { %1801 = vrcp.f32 %v736_v7  ;;  %v1833_v7 = vld [vmem:[%s2443_s0] sm:$0xff] }
 0x4d3   :  { %1803 = vrcp.f32 %v935_v43 }
 0x4d4   :  { %1805 = vrcp.f32 %v938_v55 }
 0x4d8   :  { %v1802_v51 = vpop.eup %1801 }
 0x4d9   :  { %v740_v54 = vmul.f32 %v1802_v51, %v2224_v39  ;;  %v1804_v56 = vpop.eup %1803  ;;  %v1650_v39 = vld [vmem:[%s2446_s4] sm:$0xff] }
 0x4da   :  { %v941_v57 = vmul.f32 %v1804_v56, %v2204_v50  ;;  %v1806_v59 = vpop.eup %1805 }
 0x4db   :  { %1561 = vmatmul.msk.f32.gmra.mxu1 %vm160_vm1, %v740_v54  ;;  %v942_v60 = vmul.f32 %v1806_v59, %v2217_v5 }
 0x4e3   :  { %1572 = vmatmul.msk.f32.vlgmr.msrb.gmra.mxu1 %vm160_vm1, %v941_v57  ;;  %v1834_v57 = vld [vmem:[%s2443_s0 + $0x8] sm:$0xff] }
 0x4eb   :  { %1573 = vmatmul.msk.f32.gmra.mxu1 %vm160_vm1, %v942_v60 }
 0x50b   :  { %v347_v61 = vpop.f32.mrf.mxu2 }
 0x50c   :  { %v1704_v37 = vpack.i.bf16 %v347_v61, %v344_v2 }
 0x50e   :  { %1705 = vrot.lane.b32.xlu1 %v1704_v37, %s1838_s23  ;;  %v1835_v37 = vld [vmem:[%s2443_s0 + $0x10] sm:$0xff] }
 0x513   :  { %v444_v62 = vpop.f32.mrf.mxu2 }
 0x51b   :  { %v447_v63 = vpop.f32.mrf.mxu2 }
 0x51c   :  { %v1709_v3 = vpack.i.bf16 %v447_v63, %v444_v62  ;;  %v1844_v63 = vmov 64.0  }
 0x51d   :  { %1807 = vrcp.f32 %v1844_v63 }
 0x51e   :  { %1710 = vrot.lane.b32.xlu2 %v1709_v3, %s1842_s28 }
 0x523   :  { %v670_v50 = vpop.f32.mrf.mxu2 }
 0x526   :  { %1715 = vrot.lane.b32.xlu2 %v1714_v15, %s1840_s3  ;;  %v1651_v15 = vld [vmem:[%s2446_s4 + $0x8] sm:$0xff] }
 0x527   :  { %1058 = vmatpush.bf16.msrb.mxu3 %v1651_v15 }
 0x529   :  { %v772_v5 = vpop.f32.mrf.mxu1 }
 0x52b   :  { %v673_v52 = vpop.f32.mrf.mxu2  ;;  %1059 = vmatpush.bf16.msrb.mxu3 %v1650_v39 }
 0x549   :  { %v872_v4 = vpop.f32.mrf.mxu2 }
 0x551   :  { %v875_v42 = vpop.f32.mrf.mxu2 }
 0x552   :  { %v1724_v58 = vpack.i.bf16 %v875_v42, %v872_v4 }
 0x554   :  { %1725 = vrot.lane.b32.xlu2 %v1724_v58, %s1842_s28 }
 0x558   :  { %v775_v8 = vpop.f32.mrf.mxu1 }
 0x559   :  { %v1719_v10 = vpack.i.bf16 %v775_v8, %v772_v5  ;;  %v1836_v5 = vld [vmem:[%s2443_s0 + $0x18] sm:$0xff] }
 0x55b   :  { %1720 = vrot.lane.b32.xlu1 %v1719_v10, %s1838_s23 }
 0x560   :  { %v972_v14 = vpop.f32.mrf.mxu1 }
 0x568   :  { %v975_v12 = vpop.f32.mrf.mxu1 }
 0x569   :  { %v1729_v16 = vpack.i.bf16 %v975_v12, %v972_v14 }
 0x56b   :  { %1730 = vrot.lane.b32.xlu1 %v1729_v16, %s1840_s3 }
 0x578   :  { %v1711_v25 = vpop.permute.xlu2 %1710 }
 0x579   :  { %v1713_v19 = vunpack.i.h.bf16 %v1711_v25  ;;  %v1712_v21 = vunpack.i.l.bf16 %v1711_v25 }
 0x580   :  { %v1706_v6 = vpop.permute.xlu1 %1705  ;;  %v1716_v20 = vpop.permute.xlu2 %1715 }
 0x581   :  { %v1708_v17 = vunpack.i.h.bf16 %v1706_v6  ;;  %v1707_v18 = vunpack.i.l.bf16 %v1706_v6  ;;  %v1718_v26 = vunpack.i.h.bf16 %v1716_v20  ;;  %v1717_v27 = vunpack.i.l.bf16 %v1716_v20 }
 0x583   :  { %v575_v22 = vsel %vm160_vm1, %v2121_v1, %v1708_v17  ;;  %v574_v23 = vsel %vm160_vm1, %v2119_v0, %v1707_v18 }
 0x584   :  { %v577_v28 = vsel %vm576_vm2, %v574_v23, %v1712_v21  ;;  %v578_v29 = vsel %vm576_vm2, %v575_v22, %v1713_v19 }
 0x585   :  { %v580_v30 = vsel %vm579_vm3, %v577_v28, %v1717_v27  ;;  %v581_v32 = vsel %vm579_vm3, %v578_v29, %v1718_v26 }
 0x586   :  { %v1008_v33 = vpack.c.bf16 %v581_v32, %v580_v30 }
 0x588   :  { %1590 = vmatmul.msk.bf16.vlgmr.msrb.gmra.mxu3 %vm108_vm0, %v1008_v33 }
 0x5ae   :  { %v1726_v1 = vpop.permute.xlu2 %1725 }
 0x5af   :  { %v1728_v38 = vunpack.i.h.bf16 %v1726_v1  ;;  %v1727_v40 = vunpack.i.l.bf16 %v1726_v1 }
 0x5cd   :  { %v1721_v34 = vpop.permute.xlu1 %1720 }
 0x5ce   :  { %v1723_v24 = vunpack.i.h.bf16 %v1721_v34  ;;  %v1722_v35 = vunpack.i.l.bf16 %v1721_v34  ;;  %v1657_v34 = vld [vmem:[%s2450_s8 + $0x18] sm:$0xff] }
 0x5cf   :  { %1234 = vmatpush.bf16.msrb.mxu2 %v1657_v34  ;;  %v1662_v34 = vld [vmem:[%s2452_s10 + $0x20] sm:$0xff] }
 0x5d0   :  { %v1002_v36 = vsel %vm160_vm1, %v670_v50, %v1722_v35  ;;  %v1003_v0 = vsel %vm160_vm1, %v673_v52, %v1723_v24  ;;  %v1808_v52 = vpop.eup %1807  ;;  %v1656_v24 = vld [vmem:[%s2450_s8 + $0x10] sm:$0xff]  ;;  %v1655_v35 = vld [vmem:[%s2450_s8 + $0x8] sm:$0xff] }
 0x5d1   :  { %v1004_v45 = vsel %vm576_vm2, %v1002_v36, %v1727_v40  ;;  %v1005_v41 = vsel %vm576_vm2, %v1003_v0, %v1728_v38  ;;  %v1090_v58 = vmul.f32 64.0, %v1808_v52  ;;  %vm1094_vm4 = vweird.f32 %v1808_v52  ;;  %v1654_v38 = vld [vmem:[%s2450_s8] sm:$0xff] }
 0x5d3   :  { %v1091_v9 = vsub.f32 1.0, %v1090_v58  ;;  %1235 = vmatpush.bf16.msrb.mxu2 %v1656_v24  ;;  %v1661_v24 = vld [vmem:[%s2452_s10 + $0x18] sm:$0xff] }
 0x5d5   :  { %v1092_v10 = vmul.f32 %v1808_v52, %v1091_v9 }
 0x5d7   :  { %v1093_v13 = vadd.f32 %v1808_v52, %v1092_v10  ;;  %1236 = vmatpush.bf16.msrb.mxu2 %v1655_v35  ;;  %v1660_v35 = vld [vmem:[%s2452_s10 + $0x10] sm:$0xff] }
 0x5d9   :  { %v2304_v14 = vsel %vm1094_vm4, %v1808_v52, %v1093_v13 }
 0x5db   :  { %1237 = vmatpush.bf16.msrb.mxu2 %v1654_v38  ;;  %v1658_v38 = vld [vmem:[%s2452_s10] sm:$0xff] }
 0x5dd   :  { %v1731_v11 = vpop.permute.xlu1 %1730 }
 0x5de   :  { %v1733_v43 = vunpack.i.h.bf16 %v1731_v11  ;;  %v1732_v44 = vunpack.i.l.bf16 %v1731_v11 }
 0x5e0   :  { %v1006_v46 = vsel %vm579_vm3, %v1004_v45, %v1732_v44  ;;  %v1007_v47 = vsel %vm579_vm3, %v1005_v41, %v1733_v43 }
 0x5e1   :  { %v1009_v31 = vpack.c.bf16 %v1007_v47, %v1006_v46 }
 0x5e3   :  { %1591 = vmatmul.msk.bf16.gmra.mxu3 %vm108_vm0, %v1009_v31 }
 0x60b   :  { %v1061_v49 = vpop.f32.mrf.mxu3 }
 0x60c   :  { %v1062_v53 = vadd.f32 %v1736_v48, %v1061_v49 }
 0x60e   :  { %v1071_v51 = vadd.f32 %v1833_v7, %v1062_v53 }
 0x610   :  { %v1077_v54 = vsel %vm108_vm0, %v1071_v51, 0.0 }
 0x611   :  { %1078 = vadd.xlane.f32.xlu0 %v1077_v54 }
 0x613   :  { %v1063_v55 = vpop.f32.mrf.mxu3 }
 0x614   :  { %v1064_v56 = vadd.f32 %v1736_v48, %v1063_v55  ;;  %v1737_v55 = vld [vmem:[%s2448_s6] ss:$0 sm:$0xff] }
 0x616   :  { %v1072_v59 = vadd.f32 %v1834_v57, %v1064_v56 }
 0x618   :  { %v1080_v60 = vsel %vm108_vm0, %v1072_v59, 0.0 }
 0x619   :  { %1081 = vadd.xlane.f32.xlu2 %v1080_v60  ;;  %v1738_v60 = vld [vmem:[%s2449_s7] ss:$0 sm:$0xff] }
 0x666   :  { %v1066_v2 = vpop.f32.mrf.mxu3 }
 0x667   :  { %v1067_v61 = vadd.f32 %v1736_v48, %v1066_v2 }
 0x669   :  { %v1073_v62 = vadd.f32 %v1835_v37, %v1067_v61 }
 0x66b   :  { %v1083_v3 = vsel %vm108_vm0, %v1073_v62, 0.0 }
 0x66c   :  { %1084 = vadd.xlane.f32.xlu1 %v1083_v3 }
 0x66e   :  { %v1068_v50 = vpop.f32.mrf.mxu3 }
 0x66f   :  { %v1069_v4 = vadd.f32 %v1736_v48, %v1068_v50 }
 0x671   :  { %v1074_v42 = vadd.f32 %v1836_v5, %v1069_v4 }
 0x673   :  { %v1086_v8 = vsel %vm108_vm0, %v1074_v42, 0.0 }
 0x674   :  { %1087 = vadd.xlane.f32.xlu0 %v1086_v8 }
 0x684   :  { %v1079_v15 = vpop.xlane.xlu0 %1078 }
 0x685   :  { %v1096_v39 = vmul.f32 %v2304_v14, %v1079_v15 }
 0x687   :  { %v1100_v12 = vsub.f32 %v1071_v51, %v1096_v39 }
 0x689   :  { %v1104_v16 = vmul.f32 %v1100_v12, %v1100_v12 }
 0x68b   :  { %v1108_v25 = vsel %vm108_vm0, %v1104_v16, 0.0 }
 0x68c   :  { %v1082_v6 = vpop.xlane.xlu2 %1081  ;;  %1109 = vadd.xlane.f32.xlu0 %v1108_v25 }
 0x68d   :  { %v1097_v17 = vmul.f32 %v2304_v14, %v1082_v6 }
 0x68f   :  { %v1101_v18 = vsub.f32 %v1072_v59, %v1097_v17 }
 0x691   :  { %v1105_v20 = vmul.f32 %v1101_v18, %v1101_v18 }
 0x693   :  { %v1111_v19 = vsel %vm108_vm0, %v1105_v20, 0.0 }
 0x694   :  { %1112 = vadd.xlane.f32.xlu0 %v1111_v19 }
 0x6df   :  { %v1085_v21 = vpop.xlane.xlu1 %1084 }
 0x6e0   :  { %v1098_v22 = vmul.f32 %v2304_v14, %v1085_v21 }
 0x6e2   :  { %v2311_v23 = vsub.f32 %v1073_v62, %v1098_v22 }
 0x6e4   :  { %v1106_v26 = vmul.f32 %v2311_v23, %v2311_v23 }
 0x6e6   :  { %v1114_v27 = vsel %vm108_vm0, %v1106_v26, 0.0 }
 0x6e7   :  { %v1088_v28 = vpop.xlane.xlu0 %1087  ;;  %1115 = vadd.xlane.f32.xlu0 %v1114_v27 }
 0x6e8   :  { %v1099_v29 = vmul.f32 %v2304_v14, %v1088_v28 }
 0x6ea   :  { %v2317_v30 = vsub.f32 %v1074_v42, %v1099_v29 }
 0x6ec   :  { %v1107_v32 = vmul.f32 %v2317_v30, %v2317_v30 }
 0x6ee   :  { %v1117_v33 = vsel %vm108_vm0, %v1107_v32, 0.0 }
 0x6ef   :  { %1118 = vadd.xlane.f32.xlu0 %v1117_v33  ;;  %v1663_v33 = vld [vmem:[%s2452_s10 + $0x28] sm:$0xff] }
 0x6ff   :  { %v1110_v1 = vpop.xlane.xlu0 %1109 }
 0x700   :  { %v1120_v36 = vmul.f32 %v1110_v1, %v2304_v14  ;;  %v1659_v1 = vld [vmem:[%s2452_s10 + $0x8] sm:$0xff] }
 0x702   :  { %v1124_v0 = vadd.f32 1e-05, %v1120_v36  ;;  %v1739_v36 = vld [vmem:[%s2451_s9] ss:$0 sm:$0xff] }
 0x704   :  { %1809 = vrsqrt.f32 %v1124_v0  ;;  %vm1134_vm6 = vweird.f32 %v1124_v0 }
 0x707   :  { %v1113_v40 = vpop.xlane.xlu0 %1112 }
 0x708   :  { %v1121_v11 = vmul.f32 %v1113_v40, %v2304_v14 }
 0x70a   :  { %v1810_v43 = vpop.eup %1809  ;;  %v1125_v44 = vadd.f32 1e-05, %v1121_v11 }
 0x70b   :  { %v1129_v45 = vmul.f32 %v1810_v43, %v1124_v0  ;;  %vm1135_vm5 = vweird.f32 %v1810_v43 }
 0x70c   :  { %1811 = vrsqrt.f32 %v1125_v44  ;;  %vm1136_vm7 = vmor %vm1134_vm6, %vm1135_vm5  ;;  %vm1144_vm9 = vweird.f32 %v1125_v44 }
 0x70d   :  { %v1130_v41 = vmul.f32 %v1810_v43, %v1129_v45 }
 0x70f   :  { %v1131_v46 = vmul.f32 0.5, %v1130_v41 }
 0x711   :  { %v1132_v47 = vsub.f32 1.5, %v1131_v46 }
 0x712   :  { %v1812_v31 = vpop.eup %1811 }
 0x713   :  { %v1133_v48 = vmul.f32 %v1810_v43, %v1132_v47  ;;  %v1139_v49 = vmul.f32 %v1812_v31, %v1125_v44  ;;  %vm1145_vm8 = vweird.f32 %v1812_v31 }
 0x714   :  { %vm1146_vm10 = vmor %vm1144_vm9, %vm1145_vm8 }
 0x715   :  { %v1140_v53 = vmul.f32 %v1812_v31, %v1139_v49  ;;  %v1137_v7 = vsel %vm1136_vm7, %v1810_v43, %v1133_v48 }
 0x716   :  { %v1168_v56 = vmul.f32 %v1137_v7, %v1100_v12 }
 0x717   :  { %v1141_v51 = vmul.f32 0.5, %v1140_v53 }
 0x718   :  { %v1175_v2 = vmul.f32 %v1737_v55, %v1168_v56 }
 0x719   :  { %v1142_v54 = vsub.f32 1.5, %v1141_v51 }
 0x71a   :  { %v2342_v62 = vadd.f32 %v1738_v60, %v1175_v2 }
 0x71b   :  { %v1143_v57 = vmul.f32 %v1812_v31, %v1142_v54 }
 0x71d   :  { %v1147_v59 = vsel %vm1146_vm10, %v1812_v31, %v1143_v57 }
 0x71e   :  { %v1169_v61 = vmul.f32 %v1147_v59, %v1101_v18 }
 0x720   :  { %v1176_v37 = vmul.f32 %v1737_v55, %v1169_v61 }
 0x722   :  { %v2344_v63 = vadd.f32 %v1738_v60, %v1176_v37 }
 0x724   :  { %v1186_v3 = vpack.c.bf16 %v2344_v63, %v2342_v62 }
 0x726   :  { %1608 = vmatmul.msk.bf16.vlgmr.msrb.gmra.mxu2 %vm108_vm0, %v1186_v3 }
 0x75a   :  { %v1116_v50 = vpop.xlane.xlu0 %1115 }
 0x75b   :  { %v1122_v52 = vmul.f32 %v1116_v50, %v2304_v14 }
 0x75d   :  { %v1126_v4 = vadd.f32 1e-05, %v1122_v52 }
 0x75f   :  { %1813 = vrsqrt.f32 %v1126_v4  ;;  %vm1154_vm12 = vweird.f32 %v1126_v4 }
 0x762   :  { %v1119_v5 = vpop.xlane.xlu0 %1118 }
 0x763   :  { %v1123_v42 = vmul.f32 %v1119_v5, %v2304_v14 }
 0x765   :  { %v1814_v58 = vpop.eup %1813  ;;  %v1127_v8 = vadd.f32 1e-05, %v1123_v42 }
 0x766   :  { %v1149_v9 = vmul.f32 %v1814_v58, %v1126_v4  ;;  %vm1155_vm11 = vweird.f32 %v1814_v58 }
 0x767   :  { %1815 = vrsqrt.f32 %v1127_v8  ;;  %vm1156_vm13 = vmor %vm1154_vm12, %vm1155_vm11  ;;  %vm1164_vm15 = vweird.f32 %v1127_v8 }
 0x768   :  { %v1150_v10 = vmul.f32 %v1814_v58, %v1149_v9 }
 0x76a   :  { %v1151_v13 = vmul.f32 0.5, %v1150_v10 }
 0x76c   :  { %v1152_v15 = vsub.f32 1.5, %v1151_v13 }
 0x76d   :  { %v1816_v39 = vpop.eup %1815 }
 0x76e   :  { %v1153_v12 = vmul.f32 %v1814_v58, %v1152_v15  ;;  %v1159_v16 = vmul.f32 %v1816_v39, %v1127_v8  ;;  %vm1165_vm14 = vweird.f32 %v1816_v39 }
 0x76f   :  { %vm1166_vm1 = vmor %vm1164_vm15, %vm1165_vm14 }
 0x770   :  { %v1160_v25 = vmul.f32 %v1816_v39, %v1159_v16  ;;  %v1157_v6 = vsel %vm1156_vm13, %v1814_v58, %v1153_v12 }
 0x771   :  { %v1170_v20 = vmul.f32 %v1157_v6, %v2311_v23  ;;  %v1665_v23 = vld [vmem:[%s2452_s10 + $0x38] sm:$0xff] }
 0x772   :  { %v1161_v17 = vmul.f32 0.5, %v1160_v25  ;;  %1355 = vmatpush.bf16.msra.mxu0 %v1665_v23 }
 0x773   :  { %v1177_v26 = vmul.f32 %v1737_v55, %v1170_v20 }
 0x774   :  { %v1162_v18 = vsub.f32 1.5, %v1161_v17 }
 0x775   :  { %v2353_v28 = vadd.f32 %v1738_v60, %v1177_v26 }
 0x776   :  { %v1163_v19 = vmul.f32 %v1816_v39, %v1162_v18 }
 0x778   :  { %v1167_v21 = vsel %vm1166_vm1, %v1816_v39, %v1163_v19 }
 0x779   :  { %v1171_v22 = vmul.f32 %v1167_v21, %v2317_v30  ;;  %v1664_v30 = vld [vmem:[%s2452_s10 + $0x30] sm:$0xff] }
 0x77a   :  { %1356 = vmatpush.bf16.msra.mxu0 %v1664_v30 }
 0x77b   :  { %v1178_v27 = vmul.f32 %v1737_v55, %v1171_v22  ;;  %v1740_v22 = vld [vmem:[%s2453_s11] ss:$0 sm:$0xff] }
 0x77d   :  { %v2355_v29 = vadd.f32 %v1738_v60, %v1178_v27 }
 0x77e   :  { %1357 = vmatpush.bf16.msra.mxu0 %v1663_v33 }
 0x77f   :  { %v1187_v32 = vpack.c.bf16 %v2355_v29, %v2353_v28 }
 0x781   :  { %1609 = vmatmul.msk.bf16.gmra.mxu2 %vm108_vm0, %v1187_v32 }
 0x782   :  { %1358 = vmatpush.bf16.msra.mxu0 %v1662_v34 }
 0x786   :  { %1359 = vmatpush.bf16.msra.mxu0 %v1661_v24 }
 0x78a   :  { %1360 = vmatpush.bf16.msra.mxu0 %v1660_v35 }
 0x78e   :  { %1361 = vmatpush.bf16.msra.mxu0 %v1659_v1 }
 0x792   :  { %1362 = vmatpush.bf16.msra.mxu0 %v1658_v38 }
 0x7a9   :  { %v1239_v0 = vpop.f32.mrf.mxu2 }
 0x7aa   :  { %v1240_v40 = vadd.f32 %v1739_v36, %v1239_v0 }
 0x7ac   :  { %v1249_v11 = vmul.f32 %v1240_v40, %v1240_v40 }
 0x7ae   :  { %v1253_v43 = vmul.f32 %v1249_v11, %v1240_v40 }
 0x7b0   :  { %v1257_v44 = vmul.f32 0.044715, %v1253_v43 }
 0x7b1   :  { %v1241_v45 = vpop.f32.mrf.mxu2 }
 0x7b2   :  { %v1261_v41 = vadd.f32 %v1257_v44, %v1240_v40  ;;  %v1242_v46 = vadd.f32 %v1739_v36, %v1241_v45 }
 0x7b4   :  { %v1265_v47 = vmul.f32 0.7978846, %v1261_v41  ;;  %v1250_v31 = vmul.f32 %v1242_v46, %v1242_v46 }
 0x7b6   :  { %v1254_v48 = vmul.f32 %v1250_v31, %v1242_v46  ;;  %1817 = vtanh.f32 %v1265_v47 }
 0x7b8   :  { %v1258_v49 = vmul.f32 0.044715, %v1254_v48 }
 0x7ba   :  { %v1262_v53 = vadd.f32 %v1258_v49, %v1242_v46 }
 0x7bc   :  { %v1266_v7 = vmul.f32 0.7978846, %v1262_v53  ;;  %v1818_v51 = vpop.eup %1817 }
 0x7bd   :  { %v1273_v54 = vadd.f32 1.0, %v1818_v51 }
 0x7be   :  { %1819 = vtanh.f32 %v1266_v7 }
 0x7bf   :  { %v1277_v56 = vmul.f32 0.5, %v1273_v54 }
 0x7c1   :  { %v1281_v60 = vmul.f32 %v1277_v56, %v1240_v40 }
 0x7c4   :  { %v1820_v55 = vpop.eup %1819 }
 0x7c5   :  { %v1274_v57 = vadd.f32 1.0, %v1820_v55 }
 0x7c7   :  { %v1278_v59 = vmul.f32 0.5, %v1274_v57 }
 0x7c9   :  { %v1282_v2 = vmul.f32 %v1278_v59, %v1242_v46 }
 0x7cb   :  { %v1285_v61 = vpack.c.bf16 %v1282_v2, %v1281_v60 }
 0x7cd   :  { %1363 = vmatmul.bf16.vlgmr.msra.gmra.mxu0 %v1285_v61 }
 0x804   :  { %v1244_v37 = vpop.f32.mrf.mxu2 }
 0x805   :  { %v1245_v3 = vadd.f32 %v1739_v36, %v1244_v37 }
 0x807   :  { %v1251_v50 = vmul.f32 %v1245_v3, %v1245_v3 }
 0x809   :  { %v1255_v52 = vmul.f32 %v1251_v50, %v1245_v3 }
 0x80b   :  { %v1259_v4 = vmul.f32 0.044715, %v1255_v52 }
 0x80c   :  { %v1246_v5 = vpop.f32.mrf.mxu2 }
 0x80d   :  { %v1263_v42 = vadd.f32 %v1259_v4, %v1245_v3  ;;  %v1247_v58 = vadd.f32 %v1739_v36, %v1246_v5 }
 0x80f   :  { %v1252_v8 = vmul.f32 %v1247_v58, %v1247_v58  ;;  %v1267_v9 = vmul.f32 0.7978846, %v1263_v42 }
 0x811   :  { %v1256_v10 = vmul.f32 %v1252_v8, %v1247_v58  ;;  %1821 = vtanh.f32 %v1267_v9 }
 0x813   :  { %v1260_v13 = vmul.f32 0.044715, %v1256_v10 }
 0x815   :  { %v1264_v15 = vadd.f32 %v1260_v13, %v1247_v58  ;;  %v1741_v13 = vld [vmem:[%s2454_s12] ss:$0 sm:$0xff] }
 0x817   :  { %v1268_v39 = vmul.f32 0.7978846, %v1264_v15  ;;  %v1822_v12 = vpop.eup %1821 }
 0x818   :  { %v1275_v16 = vadd.f32 1.0, %v1822_v12  ;;  %v1742_v12 = vld [vmem:[%s2455_s13] ss:$0 sm:$0xff] }
 0x819   :  { %1823 = vtanh.f32 %v1268_v39 }
 0x81a   :  { %v1279_v17 = vmul.f32 0.5, %v1275_v16 }
 0x81c   :  { %v1283_v20 = vmul.f32 %v1279_v17, %v1245_v3 }
 0x81f   :  { %v1824_v25 = vpop.eup %1823 }
 0x820   :  { %v1276_v6 = vadd.f32 1.0, %v1824_v25 }
 0x822   :  { %v1280_v18 = vmul.f32 0.5, %v1276_v6 }
 0x824   :  { %v1284_v19 = vmul.f32 %v1280_v18, %v1247_v58 }
 0x826   :  { %v1286_v21 = vpack.c.bf16 %v1284_v19, %v1283_v20 }
 0x828   :  { %1368 = vmatmul.bf16.gmra.mxu0 %v1286_v21 }
 0x84a   :  { %v1364_v26 = vpop.f32.mrf.mxu0 }
 0x84b   :  { %v1365_v27 = vadd.f32 %v1740_v22, %v1364_v26 }
 0x84d   :  { %v1374_v32 = vadd.f32 %v1365_v27, %v2342_v62 }
 0x84f   :  { %v1380_v23 = vsel %vm108_vm0, %v1374_v32, 0.0 }
 0x850   :  { %1381 = vadd.xlane.f32.xlu2 %v1380_v23 }
 0x852   :  { %v1366_v30 = vpop.f32.mrf.mxu0 }
 0x853   :  { %v1367_v33 = vadd.f32 %v1740_v22, %v1366_v30 }
 0x855   :  { %v1375_v34 = vadd.f32 %v1367_v33, %v2344_v63 }
 0x857   :  { %v1383_v24 = vsel %vm108_vm0, %v1375_v34, 0.0 }
 0x858   :  { %1384 = vadd.xlane.f32.xlu0 %v1383_v24 }
 0x8a5   :  { %v1369_v35 = vpop.f32.mrf.mxu0 }
 0x8a6   :  { %v1370_v1 = vadd.f32 %v1740_v22, %v1369_v35 }
 0x8a8   :  { %v1376_v36 = vadd.f32 %v1370_v1, %v2353_v28 }
 0x8aa   :  { %v1386_v0 = vsel %vm108_vm0, %v1376_v36, 0.0 }
 0x8ab   :  { %1387 = vadd.xlane.f32.xlu1 %v1386_v0 }
 0x8ad   :  { %v1371_v38 = vpop.f32.mrf.mxu0 }
 0x8ae   :  { %v1372_v40 = vadd.f32 %v1740_v22, %v1371_v38 }
 0x8b0   :  { %v1377_v62 = vadd.f32 %v1372_v40, %v2355_v29 }
 0x8b2   :  { %v1389_v11 = vsel %vm108_vm0, %v1377_v62, 0.0 }
 0x8b3   :  { %1390 = vadd.xlane.f32.xlu2 %v1389_v11 }
 0x8c3   :  { %v1382_v43 = vpop.xlane.xlu2 %1381 }
 0x8c4   :  { %v1392_v63 = vmul.f32 %v1382_v43, %v2304_v14 }
 0x8c6   :  { %v1396_v44 = vsub.f32 %v1374_v32, %v1392_v63 }
 0x8c8   :  { %v1400_v45 = vmul.f32 %v1396_v44, %v1396_v44 }
 0x8ca   :  { %v1404_v41 = vsel %vm108_vm0, %v1400_v45, 0.0 }
 0x8cb   :  { %1405 = vadd.xlane.f32.xlu0 %v1404_v41  ;;  %v1385_v46 = vpop.xlane.xlu0 %1384 }
 0x8cc   :  { %v1393_v28 = vmul.f32 %v1385_v46, %v2304_v14 }
 0x8ce   :  { %v1397_v47 = vsub.f32 %v1375_v34, %v1393_v28 }
 0x8d0   :  { %v1401_v31 = vmul.f32 %v1397_v47, %v1397_v47 }
 0x8d2   :  { %v1407_v48 = vsel %vm108_vm0, %v1401_v31, 0.0 }
 0x8d3   :  { %1408 = vadd.xlane.f32.xlu1 %v1407_v48 }
 0x91e   :  { %v1388_v29 = vpop.xlane.xlu1 %1387 }
 0x91f   :  { %v1394_v49 = vmul.f32 %v1388_v29, %v2304_v14 }
 0x921   :  { %v2403_v53 = vsub.f32 %v1376_v36, %v1394_v49 }
 0x923   :  { %v1402_v7 = vmul.f32 %v2403_v53, %v2403_v53 }
 0x925   :  { %v1410_v51 = vsel %vm108_vm0, %v1402_v7, 0.0 }
 0x926   :  { %v1391_v54 = vpop.xlane.xlu2 %1390  ;;  %1411 = vadd.xlane.f32.xlu2 %v1410_v51 }
 0x927   :  { %v1395_v55 = vmul.f32 %v1391_v54, %v2304_v14 }
 0x929   :  { %v2409_v56 = vsub.f32 %v1377_v62, %v1395_v55 }
 0x92b   :  { %v1403_v57 = vmul.f32 %v2409_v56, %v2409_v56 }
 0x92d   :  { %v1413_v59 = vsel %vm108_vm0, %v1403_v57, 0.0 }
 0x92e   :  { %1414 = vadd.xlane.f32.xlu0 %v1413_v59 }
 0x93e   :  { %v1406_v60 = vpop.xlane.xlu0 %1405 }
 0x93f   :  { %v1416_v2 = vmul.f32 %v1406_v60, %v2304_v14 }
 0x941   :  { %v1420_v61 = vadd.f32 1e-05, %v1416_v2 }
 0x943   :  { %1825 = vrsqrt.f32 %v1420_v61  ;;  %vm1430_vm3 = vweird.f32 %v1420_v61 }
 0x946   :  { %v1409_v37 = vpop.xlane.xlu1 %1408 }
 0x947   :  { %v1417_v3 = vmul.f32 %v1409_v37, %v2304_v14 }
 0x949   :  { %v1826_v50 = vpop.eup %1825  ;;  %v1421_v52 = vadd.f32 1e-05, %v1417_v3 }
 0x94a   :  { %v1425_v4 = vmul.f32 %v1826_v50, %v1420_v61  ;;  %vm1431_vm2 = vweird.f32 %v1826_v50 }
 0x94b   :  { %1827 = vrsqrt.f32 %v1421_v52  ;;  %vm1432_vm4 = vmor %vm1430_vm3, %vm1431_vm2  ;;  %vm1440_vm6 = vweird.f32 %v1421_v52 }
 0x94c   :  { %v1426_v5 = vmul.f32 %v1826_v50, %v1425_v4 }
 0x94e   :  { %v1427_v42 = vmul.f32 0.5, %v1426_v5 }
 0x950   :  { %v1428_v58 = vsub.f32 1.5, %v1427_v42 }
 0x951   :  { %v1828_v8 = vpop.eup %1827 }
 0x952   :  { %v1429_v9 = vmul.f32 %v1826_v50, %v1428_v58  ;;  %v1435_v10 = vmul.f32 %v1828_v8, %v1421_v52  ;;  %vm1441_vm5 = vweird.f32 %v1828_v8 }
 0x953   :  { %vm1442_vm7 = vmor %vm1440_vm6, %vm1441_vm5 }
 0x954   :  { %v1433_v15 = vsel %vm1432_vm4, %v1826_v50, %v1429_v9  ;;  %v1436_v39 = vmul.f32 %v1828_v8, %v1435_v10 }
 0x955   :  { %v1464_v16 = vmul.f32 %v1433_v15, %v1396_v44 }
 0x956   :  { %v1437_v25 = vmul.f32 0.5, %v1436_v39 }
 0x957   :  { %v1471_v6 = vmul.f32 %v1741_v13, %v1464_v16 }
 0x958   :  { %v1438_v17 = vsub.f32 1.5, %v1437_v25 }
 0x959   :  { %v1478_v18 = vadd.f32 %v1742_v12, %v1471_v6 }
 0x95a   :  { %v1439_v20 = vmul.f32 %v1828_v8, %v1438_v17 }
 0x95b   :  { %1482 = vst.msk [vmem:[%s2456_s14] sm:$0xff] %vm108_vm0, %v1478_v18 }
 0x95c   :  { %v1443_v19 = vsel %vm1442_vm7, %v1828_v8, %v1439_v20 }
 0x95d   :  { %v1465_v21 = vmul.f32 %v1443_v19, %v1397_v47 }
 0x95f   :  { %v1472_v22 = vmul.f32 %v1741_v13, %v1465_v21 }
 0x961   :  { %v1479_v26 = vadd.f32 %v1742_v12, %v1472_v22 }
 0x963   :  { %1483 = vst.msk [vmem:[%s2456_s14 + $0x8] sm:$0xff] %vm108_vm0, %v1479_v26 }
 0x999   :  { %v1412_v27 = vpop.xlane.xlu2 %1411 }
 0x99a   :  { %v1418_v32 = vmul.f32 %v1412_v27, %v2304_v14 }
 0x99c   :  { %v1422_v23 = vadd.f32 1e-05, %v1418_v32 }
 0x99e   :  { %1829 = vrsqrt.f32 %v1422_v23  ;;  %vm1450_vm9 = vweird.f32 %v1422_v23 }
 0x9a1   :  { %v1415_v30 = vpop.xlane.xlu0 %1414 }
 0x9a2   :  { %v1419_v33 = vmul.f32 %v1415_v30, %v2304_v14 }
 0x9a4   :  { %v1830_v34 = vpop.eup %1829  ;;  %v1423_v24 = vadd.f32 1e-05, %v1419_v33 }
 0x9a5   :  { %v1445_v35 = vmul.f32 %v1830_v34, %v1422_v23  ;;  %vm1451_vm8 = vweird.f32 %v1830_v34 }
 0x9a6   :  { %1831 = vrsqrt.f32 %v1423_v24  ;;  %vm1452_vm10 = vmor %vm1450_vm9, %vm1451_vm8  ;;  %vm1460_vm12 = vweird.f32 %v1423_v24 }
 0x9a7   :  { %v1446_v1 = vmul.f32 %v1830_v34, %v1445_v35 }
 0x9a9   :  { %v1447_v36 = vmul.f32 0.5, %v1446_v1 }
 0x9ab   :  { %v1448_v0 = vsub.f32 1.5, %v1447_v36 }
 0x9ac   :  { %v1832_v38 = vpop.eup %1831 }
 0x9ad   :  { %v1449_v40 = vmul.f32 %v1830_v34, %v1448_v0  ;;  %v1455_v62 = vmul.f32 %v1832_v38, %v1423_v24  ;;  %vm1461_vm11 = vweird.f32 %v1832_v38 }
 0x9ae   :  { %vm1462_vm13 = vmor %vm1460_vm12, %vm1461_vm11 }
 0x9af   :  { %v1453_v11 = vsel %vm1452_vm10, %v1830_v34, %v1449_v40  ;;  %v1456_v43 = vmul.f32 %v1832_v38, %v1455_v62 }
 0x9b0   :  { %v1466_v63 = vmul.f32 %v1453_v11, %v2403_v53 }
 0x9b1   :  { %v1457_v44 = vmul.f32 0.5, %v1456_v43 }
 0x9b2   :  { %v1473_v45 = vmul.f32 %v1741_v13, %v1466_v63 }
 0x9b3   :  { %v1458_v14 = vsub.f32 1.5, %v1457_v44 }
 0x9b4   :  { %v1480_v41 = vadd.f32 %v1742_v12, %v1473_v45 }
 0x9b5   :  { %v1459_v46 = vmul.f32 %v1832_v38, %v1458_v14 }
 0x9b6   :  { %1484 = vst.msk [vmem:[%s2456_s14 + $0x10] sm:$0xff] %vm108_vm0, %v1480_v41 }
 0x9b7   :  { %v1463_v28 = vsel %vm1462_vm13, %v1832_v38, %v1459_v46 }
 0x9b8   :  { %v1467_v47 = vmul.f32 %v1463_v28, %v2409_v56 }
 0x9ba   :  { %v1474_v31 = vmul.f32 %v1741_v13, %v1467_v47 }
 0x9bc   :  { %v1481_v48 = vadd.f32 %v1742_v12, %v1474_v31 }
 0x9be   :  { %1485 = vst.msk [vmem:[%s2456_s14 + $0x18] sm:$0xff] %vm108_vm0, %v1481_v48 }

</bundles_post_ra>
